<compile_context>
chip_gen: v6e
topology: v6e:2x2x1
jax: 0.10.0
libtpu: 0.0.40
codegen_flags: <defaults>
</compile_context>

<pallas_src>
import functools

import jax
import jax.numpy as jnp
from jax import lax
from jax.experimental import pallas as pl
from jax.experimental.pallas import tpu as pltpu


# -----------------------------------------------------------------------------
# Fused kernel: all LSTM layers + classifier in one pallas_call.
#
#  refs layout (inputs..., output):
#   x_ref                    : (T*Bp, E)      time-major, flattened, batch-padded
#   per layer l:
#     wih_ref_l              : (Din_l, 4H)    W_ih^T   (gate order i, f, g, o)
#     whh_ref_l              : (H,     4H)    W_hh^T
#     b_ref_l                : (1,     4H)    b_ih + b_hh
#   cls_w_ref                : (2, H)         Linear weight (PyTorch layout)
#   cls_b_ref                : (1, 2)
#   o_ref                    : (Bp, 2)        softmax probabilities
# -----------------------------------------------------------------------------
def _make_bert_net_kernel(T, Bp, hidden_dim, num_layers):
    H = hidden_dim

    def kernel(*refs):
        x_ref = refs[0]
        lstm_refs = refs[1:1 + 3 * num_layers]
        cls_w_ref = refs[1 + 3 * num_layers]
        cls_b_ref = refs[2 + 3 * num_layers]
        o_ref = refs[-1]

        # Lane mask selecting the "g" gate lanes [2H, 3H) of the (Bp, 4H) vreg.
        lane = lax.broadcasted_iota(jnp.int32, (Bp, 4 * H), 1)
        g_mask = (lane >= 2 * H) & (lane < 3 * H)

        seq = x_ref[...]                      # (T*Bp, Din0)
        h = None
        for layer in range(num_layers):
            wih = lstm_refs[3 * layer][...]   # (Din, 4H)
            whh = lstm_refs[3 * layer + 1][...]  # (H, 4H)
            b = lstm_refs[3 * layer + 2][...]    # (1, 4H)

            # Hoisted input projection + bias (no serial dependency): one big
            # matmul over the whole sequence instead of T tiny ones.
            xw = jnp.dot(seq, wih, preferred_element_type=jnp.float32) + b  # (T*Bp, 4H)

            h = jnp.zeros((Bp, H), jnp.float32)
            c = jnp.zeros((Bp, H), jnp.float32)
            last_layer = layer == num_layers - 1
            outs = []

            for t in range(T):  # static -> fully unrolled recurrence
                gates = xw[t * Bp:(t + 1) * Bp, :] + jnp.dot(
                    h, whh, preferred_element_type=jnp.float32)          # (Bp, 4H)
                # Full-vreg activations: 1 tanh + 1 sigmoid + 1 select.
                act = jnp.where(g_mask, jnp.tanh(gates), jax.nn.sigmoid(gates))
                i_g = act[:, 0 * H:1 * H]
                f_g = act[:, 1 * H:2 * H]
                g_g = act[:, 2 * H:3 * H]
                o_g = act[:, 3 * H:4 * H]
                c = f_g * c + i_g * g_g
                h = o_g * jnp.tanh(c)
                if not last_layer:
                    outs.append(h)            # sequence needed by next layer only

            if not last_layer:
                seq = jnp.concatenate(outs, axis=0)   # (T*Bp, H), stays in VMEM/vregs

        # Classifier: Dropout (eval = identity) -> Linear(H, 2) -> Softmax(dim=1).
        # Tiny (2-lane) output -> keep it on the VPU/XLU, skip the MXU.
        w0 = cls_w_ref[0:1, :]                                     # (1, H)
        w1 = cls_w_ref[1:2, :]                                     # (1, H)
        logit0 = jnp.sum(h * w0, axis=1, keepdims=True)            # (Bp, 1)
        logit1 = jnp.sum(h * w1, axis=1, keepdims=True)            # (Bp, 1)
        logits = jnp.concatenate([logit0, logit1], axis=1) + cls_b_ref[...]  # (Bp, 2)
        m = jnp.max(logits, axis=1, keepdims=True)
        e = jnp.exp(logits - m)
        o_ref[...] = e / jnp.sum(e, axis=1, keepdims=True)

    return kernel


# -----------------------------------------------------------------------------
# Full Bert_Net forward (inference mode)
# -----------------------------------------------------------------------------
def bert_net_forward(sentence, params, *, hidden_dim, num_layers):
    # Embedding lookup stands in for the frozen DistilBERT encoder (glue).
    embeds = jnp.take(params["embed_table"], sentence, axis=0)     # (B, T, E)
    B, T, E = embeds.shape
    H = hidden_dim

    # time-major, pad batch to a sublane multiple (8), flatten to (T*Bp, E)
    Bp = max(8, ((B + 7) // 8) * 8)
    x_tm = jnp.transpose(embeds, (1, 0, 2)).astype(jnp.float32)    # (T, B, E)
    x_tm = jnp.pad(x_tm, ((0, 0), (0, Bp - B), (0, 0)))            # (T, Bp, E)
    x_flat = x_tm.reshape(T * Bp, E)

    inputs = [x_flat]
    in_specs = [pl.BlockSpec((T * Bp, E), lambda i: (0, 0))]
    for layer in range(num_layers):
        lp = params["lstm"][layer]
        din = E if layer == 0 else H
        inputs += [lp["wih_t"], lp["whh_t"], lp["b"]]
        in_specs += [
            pl.BlockSpec((din, 4 * H), lambda i: (0, 0)),
            pl.BlockSpec((H, 4 * H), lambda i: (0, 0)),
            pl.BlockSpec((1, 4 * H), lambda i: (0, 0)),
        ]
    inputs += [params["cls_w"], params["cls_b"]]
    in_specs += [
        pl.BlockSpec((2, H), lambda i: (0, 0)),
        pl.BlockSpec((1, 2), lambda i: (0, 0)),
    ]

    kernel = _make_bert_net_kernel(T, Bp, H, num_layers)
    probs_padded = pl.pallas_call(
        kernel,
        out_shape=jax.ShapeDtypeStruct((Bp, 2), jnp.float32),
        grid=(1,),
        in_specs=in_specs,
        out_specs=pl.BlockSpec((Bp, 2), lambda i: (0, 0)),
        compiler_params=pltpu.CompilerParams(
            dimension_semantics=("arbitrary",)),
    )(*inputs)

    return probs_padded[:B]                                        # drop pad rows


# -----------------------------------------------------------------------------
# Deterministic parameter construction (PyTorch layouts, pre-transposed)
# -----------------------------------------------------------------------------
def init_params(key, vocab_size, embedding_dim, hidden_dim, num_layers):
    keys = jax.random.split(key, 2 + 4 * num_layers + 2)
    ki = iter(keys)
    scale = 1.0 / jnp.sqrt(jnp.float32(hidden_dim))

    embed_table = jax.random.normal(next(ki), (vocab_size, embedding_dim),
                                    dtype=jnp.float32) * 0.02

    lstm_params = []
    for layer in range(num_layers):
        din = embedding_dim if layer == 0 else hidden_dim
        # PyTorch layout: W_ih (4H, Din), W_hh (4H, H), gate order [i, f, g, o]
        w_ih = jax.random.uniform(next(ki), (4 * hidden_dim, din),
                                  minval=-scale, maxval=scale, dtype=jnp.float32)
        w_hh = jax.random.uniform(next(ki), (4 * hidden_dim, hidden_dim),
                                  minval=-scale, maxval=scale, dtype=jnp.float32)
        b_ih = jax.random.uniform(next(ki), (4 * hidden_dim,),
                                  minval=-scale, maxval=scale, dtype=jnp.float32)
        b_hh = jax.random.uniform(next(ki), (4 * hidden_dim,),
                                  minval=-scale, maxval=scale, dtype=jnp.float32)
        lstm_params.append({
            "wih_t": w_ih.T,                                    # (Din, 4H)
            "whh_t": w_hh.T,                                    # (H, 4H)
            "b": (b_ih + b_hh).reshape(1, 4 * hidden_dim),      # (1, 4H)
        })

    cls_w = jax.random.uniform(next(ki), (2, hidden_dim),
                               minval=-scale, maxval=scale, dtype=jnp.float32)
    cls_b = jax.random.uniform(next(ki), (2,),
                               minval=-scale, maxval=scale, dtype=jnp.float32)

    return {
        "embed_table": embed_table,
        "lstm": lstm_params,
        "cls_w": cls_w,                                         # (2, H)
        "cls_b": cls_b.reshape(1, 2),                           # (1, 2)
    }


if __name__ == "__main__":
    embedding_dim = 32
    hidden_dim = 32
    num_layers = 2
    batch = 2
    seq_len = 8
    vocab_size = 100

    key = jax.random.PRNGKey(0)
    pkey, skey = jax.random.split(key)

    params = init_params(pkey, vocab_size, embedding_dim, hidden_dim, num_layers)
    sentence = jax.random.randint(skey, (batch, seq_len), 0, vocab_size,
                                  dtype=jnp.int32)

    forward = jax.jit(functools.partial(
        bert_net_forward, hidden_dim=hidden_dim, num_layers=num_layers))

    out = forward(sentence, params)
    out = jax.block_until_ready(out)

    assert out.shape == (batch, 2)
    assert bool(jnp.all(jnp.isfinite(out)))
    # rows are softmax distributions
    assert bool(jnp.allclose(jnp.sum(out, axis=1), 1.0, atol=1e-5))

    print("KERNEL_OK")
</pallas_src>

<mosaic_0001>
module attributes {stable_mosaic.version = 11 : i64} {
  func.func @kernel(%arg0: i32, %arg1: memref<64x32xf32, #tpu.memory_space<vmem>>, %arg2: memref<32x128xf32, #tpu.memory_space<vmem>>, %arg3: memref<32x128xf32, #tpu.memory_space<vmem>>, %arg4: memref<1x128xf32, #tpu.memory_space<vmem>>, %arg5: memref<32x128xf32, #tpu.memory_space<vmem>>, %arg6: memref<32x128xf32, #tpu.memory_space<vmem>>, %arg7: memref<1x128xf32, #tpu.memory_space<vmem>>, %arg8: memref<2x32xf32, #tpu.memory_space<vmem>>, %arg9: memref<1x2xf32, #tpu.memory_space<vmem>>, %arg10: memref<8x2xf32, #tpu.memory_space<vmem>>) attributes {dimension_semantics = [#tpu.dimension_semantics<arbitrary>], iteration_bounds = array<i64: 1>, scalar_prefetch = 0 : i64, scratch_operands = 0 : i64, tpu.core_type = #tpu.core_type<tc>, window_params = [{pipeline_mode = #tpu.pipeline_mode<synchronous>, transform_indices = @transform_0, window_bounds = array<i64: 64, 32>}, {pipeline_mode = #tpu.pipeline_mode<synchronous>, transform_indices = @transform_1, window_bounds = array<i64: 32, 128>}, {pipeline_mode = #tpu.pipeline_mode<synchronous>, transform_indices = @transform_2, window_bounds = array<i64: 32, 128>}, {pipeline_mode = #tpu.pipeline_mode<synchronous>, transform_indices = @transform_3, window_bounds = array<i64: 1, 128>}, {pipeline_mode = #tpu.pipeline_mode<synchronous>, transform_indices = @transform_4, window_bounds = array<i64: 32, 128>}, {pipeline_mode = #tpu.pipeline_mode<synchronous>, transform_indices = @transform_5, window_bounds = array<i64: 32, 128>}, {pipeline_mode = #tpu.pipeline_mode<synchronous>, transform_indices = @transform_6, window_bounds = array<i64: 1, 128>}, {pipeline_mode = #tpu.pipeline_mode<synchronous>, transform_indices = @transform_7, window_bounds = array<i64: 2, 32>}, {pipeline_mode = #tpu.pipeline_mode<synchronous>, transform_indices = @transform_8, window_bounds = array<i64: 1, 2>}, {pipeline_mode = #tpu.pipeline_mode<synchronous>, transform_indices = @transform_9, window_bounds = array<i64: 8, 2>}]} {
    %0 = tpu.iota {dimensions = array<i32: 1>} : vector<8x128xi32>
    %c64_i32 = arith.constant 64 : i32
    %1 = vector.broadcast %c64_i32 : i32 to vector<8x128xi32>
    %2 = arith.cmpi sge, %0, %1 : vector<8x128xi32>
    %c96_i32 = arith.constant 96 : i32
    %3 = vector.broadcast %c96_i32 : i32 to vector<8x128xi32>
    %4 = arith.cmpi slt, %0, %3 : vector<8x128xi32>
    %5 = arith.andi %2, %4 : vector<8x128xi1>
    %c0 = arith.constant 0 : index
    %c0_0 = arith.constant 0 : index
    %6 = vector.load %arg1[%c0, %c0_0] : memref<64x32xf32, #tpu.memory_space<vmem>>, vector<64x32xf32>
    %c0_1 = arith.constant 0 : index
    %c0_2 = arith.constant 0 : index
    %7 = vector.load %arg2[%c0_1, %c0_2] : memref<32x128xf32, #tpu.memory_space<vmem>>, vector<32x128xf32>
    %c0_3 = arith.constant 0 : index
    %c0_4 = arith.constant 0 : index
    %8 = vector.load %arg3[%c0_3, %c0_4] : memref<32x128xf32, #tpu.memory_space<vmem>>, vector<32x128xf32>
    %c0_5 = arith.constant 0 : index
    %c0_6 = arith.constant 0 : index
    %9 = vector.load %arg4[%c0_5, %c0_6] : memref<1x128xf32, #tpu.memory_space<vmem>>, vector<1x128xf32>
    %cst = arith.constant dense<0.000000e+00> : vector<64x128xf32>
    %10 = tpu.matmul %6, %7, %cst {dimension_numbers = #tpu.dot_dimension_numbers<[1], [0], [0], [1], [0, 0, 1, 1], [], []>} : vector<64x32xf32>, vector<32x128xf32>, vector<64x128xf32> -> vector<64x128xf32>
    %11 = vector.broadcast %9 : vector<1x128xf32> to vector<64x128xf32>
    %12 = arith.addf %10, %11 : vector<64x128xf32>
    %cst_7 = arith.constant 0.000000e+00 : f32
    %13 = vector.broadcast %cst_7 : f32 to vector<8x32xf32>
    %cst_8 = arith.constant 0.000000e+00 : f32
    %14 = vector.broadcast %cst_8 : f32 to vector<8x32xf32>
    %15 = vector.extract_strided_slice %12 {offsets = [0, 0], sizes = [8, 128], strides = [1, 1]} : vector<64x128xf32> to vector<8x128xf32>
    %cst_9 = arith.constant dense<0.000000e+00> : vector<8x128xf32>
    %16 = tpu.matmul %13, %8, %cst_9 {dimension_numbers = #tpu.dot_dimension_numbers<[1], [0], [0], [1], [0, 0, 1, 1], [], []>} : vector<8x32xf32>, vector<32x128xf32>, vector<8x128xf32> -> vector<8x128xf32>
    %17 = arith.addf %15, %16 : vector<8x128xf32>
    %18 = math.tanh %17 : vector<8x128xf32>
    %19 = arith.negf %17 : vector<8x128xf32>
    %20 = math.exp %19 : vector<8x128xf32>
    %cst_10 = arith.constant 1.000000e+00 : f32
    %21 = vector.broadcast %cst_10 : f32 to vector<8x128xf32>
    %22 = arith.addf %21, %20 : vector<8x128xf32>
    %23 = arith.divf %21, %22 : vector<8x128xf32>
    %24 = arith.select %5, %18, %23 : vector<8x128xi1>, vector<8x128xf32>
    %25 = vector.extract_strided_slice %24 {offsets = [0, 0], sizes = [8, 32], strides = [1, 1]} : vector<8x128xf32> to vector<8x32xf32>
    %26 = vector.extract_strided_slice %24 {offsets = [0, 32], sizes = [8, 32], strides = [1, 1]} : vector<8x128xf32> to vector<8x32xf32>
    %27 = vector.extract_strided_slice %24 {offsets = [0, 64], sizes = [8, 32], strides = [1, 1]} : vector<8x128xf32> to vector<8x32xf32>
    %28 = vector.extract_strided_slice %24 {offsets = [0, 96], sizes = [8, 32], strides = [1, 1]} : vector<8x128xf32> to vector<8x32xf32>
    %29 = arith.mulf %26, %14 : vector<8x32xf32>
    %30 = arith.mulf %25, %27 : vector<8x32xf32>
    %31 = arith.addf %29, %30 : vector<8x32xf32>
    %32 = math.tanh %31 : vector<8x32xf32>
    %33 = arith.mulf %28, %32 : vector<8x32xf32>
    %34 = vector.extract_strided_slice %12 {offsets = [8, 0], sizes = [8, 128], strides = [1, 1]} : vector<64x128xf32> to vector<8x128xf32>
    %cst_11 = arith.constant dense<0.000000e+00> : vector<8x128xf32>
    %35 = tpu.matmul %33, %8, %cst_11 {dimension_numbers = #tpu.dot_dimension_numbers<[1], [0], [0], [1], [0, 0, 1, 1], [], []>} : vector<8x32xf32>, vector<32x128xf32>, vector<8x128xf32> -> vector<8x128xf32>
    %36 = arith.addf %34, %35 : vector<8x128xf32>
    %37 = math.tanh %36 : vector<8x128xf32>
    %38 = arith.negf %36 : vector<8x128xf32>
    %39 = math.exp %38 : vector<8x128xf32>
    %cst_12 = arith.constant 1.000000e+00 : f32
    %40 = vector.broadcast %cst_12 : f32 to vector<8x128xf32>
    %41 = arith.addf %40, %39 : vector<8x128xf32>
    %42 = arith.divf %40, %41 : vector<8x128xf32>
    %43 = arith.select %5, %37, %42 : vector<8x128xi1>, vector<8x128xf32>
    %44 = vector.extract_strided_slice %43 {offsets = [0, 0], sizes = [8, 32], strides = [1, 1]} : vector<8x128xf32> to vector<8x32xf32>
    %45 = vector.extract_strided_slice %43 {offsets = [0, 32], sizes = [8, 32], strides = [1, 1]} : vector<8x128xf32> to vector<8x32xf32>
    %46 = vector.extract_strided_slice %43 {offsets = [0, 64], sizes = [8, 32], strides = [1, 1]} : vector<8x128xf32> to vector<8x32xf32>
    %47 = vector.extract_strided_slice %43 {offsets = [0, 96], sizes = [8, 32], strides = [1, 1]} : vector<8x128xf32> to vector<8x32xf32>
    %48 = arith.mulf %45, %31 : vector<8x32xf32>
    %49 = arith.mulf %44, %46 : vector<8x32xf32>
    %50 = arith.addf %48, %49 : vector<8x32xf32>
    %51 = math.tanh %50 : vector<8x32xf32>
    %52 = arith.mulf %47, %51 : vector<8x32xf32>
    %53 = vector.extract_strided_slice %12 {offsets = [16, 0], sizes = [8, 128], strides = [1, 1]} : vector<64x128xf32> to vector<8x128xf32>
    %cst_13 = arith.constant dense<0.000000e+00> : vector<8x128xf32>
    %54 = tpu.matmul %52, %8, %cst_13 {dimension_numbers = #tpu.dot_dimension_numbers<[1], [0], [0], [1], [0, 0, 1, 1], [], []>} : vector<8x32xf32>, vector<32x128xf32>, vector<8x128xf32> -> vector<8x128xf32>
    %55 = arith.addf %53, %54 : vector<8x128xf32>
    %56 = math.tanh %55 : vector<8x128xf32>
    %57 = arith.negf %55 : vector<8x128xf32>
    %58 = math.exp %57 : vector<8x128xf32>
    %cst_14 = arith.constant 1.000000e+00 : f32
    %59 = vector.broadcast %cst_14 : f32 to vector<8x128xf32>
    %60 = arith.addf %59, %58 : vector<8x128xf32>
    %61 = arith.divf %59, %60 : vector<8x128xf32>
    %62 = arith.select %5, %56, %61 : vector<8x128xi1>, vector<8x128xf32>
    %63 = vector.extract_strided_slice %62 {offsets = [0, 0], sizes = [8, 32], strides = [1, 1]} : vector<8x128xf32> to vector<8x32xf32>
    %64 = vector.extract_strided_slice %62 {offsets = [0, 32], sizes = [8, 32], strides = [1, 1]} : vector<8x128xf32> to vector<8x32xf32>
    %65 = vector.extract_strided_slice %62 {offsets = [0, 64], sizes = [8, 32], strides = [1, 1]} : vector<8x128xf32> to vector<8x32xf32>
    %66 = vector.extract_strided_slice %62 {offsets = [0, 96], sizes = [8, 32], strides = [1, 1]} : vector<8x128xf32> to vector<8x32xf32>
    %67 = arith.mulf %64, %50 : vector<8x32xf32>
    %68 = arith.mulf %63, %65 : vector<8x32xf32>
    %69 = arith.addf %67, %68 : vector<8x32xf32>
    %70 = math.tanh %69 : vector<8x32xf32>
    %71 = arith.mulf %66, %70 : vector<8x32xf32>
    %72 = vector.extract_strided_slice %12 {offsets = [24, 0], sizes = [8, 128], strides = [1, 1]} : vector<64x128xf32> to vector<8x128xf32>
    %cst_15 = arith.constant dense<0.000000e+00> : vector<8x128xf32>
    %73 = tpu.matmul %71, %8, %cst_15 {dimension_numbers = #tpu.dot_dimension_numbers<[1], [0], [0], [1], [0, 0, 1, 1], [], []>} : vector<8x32xf32>, vector<32x128xf32>, vector<8x128xf32> -> vector<8x128xf32>
    %74 = arith.addf %72, %73 : vector<8x128xf32>
    %75 = math.tanh %74 : vector<8x128xf32>
    %76 = arith.negf %74 : vector<8x128xf32>
    %77 = math.exp %76 : vector<8x128xf32>
    %cst_16 = arith.constant 1.000000e+00 : f32
    %78 = vector.broadcast %cst_16 : f32 to vector<8x128xf32>
    %79 = arith.addf %78, %77 : vector<8x128xf32>
    %80 = arith.divf %78, %79 : vector<8x128xf32>
    %81 = arith.select %5, %75, %80 : vector<8x128xi1>, vector<8x128xf32>
    %82 = vector.extract_strided_slice %81 {offsets = [0, 0], sizes = [8, 32], strides = [1, 1]} : vector<8x128xf32> to vector<8x32xf32>
    %83 = vector.extract_strided_slice %81 {offsets = [0, 32], sizes = [8, 32], strides = [1, 1]} : vector<8x128xf32> to vector<8x32xf32>
    %84 = vector.extract_strided_slice %81 {offsets = [0, 64], sizes = [8, 32], strides = [1, 1]} : vector<8x128xf32> to vector<8x32xf32>
    %85 = vector.extract_strided_slice %81 {offsets = [0, 96], sizes = [8, 32], strides = [1, 1]} : vector<8x128xf32> to vector<8x32xf32>
    %86 = arith.mulf %83, %69 : vector<8x32xf32>
    %87 = arith.mulf %82, %84 : vector<8x32xf32>
    %88 = arith.addf %86, %87 : vector<8x32xf32>
    %89 = math.tanh %88 : vector<8x32xf32>
    %90 = arith.mulf %85, %89 : vector<8x32xf32>
    %91 = vector.extract_strided_slice %12 {offsets = [32, 0], sizes = [8, 128], strides = [1, 1]} : vector<64x128xf32> to vector<8x128xf32>
    %cst_17 = arith.constant dense<0.000000e+00> : vector<8x128xf32>
    %92 = tpu.matmul %90, %8, %cst_17 {dimension_numbers = #tpu.dot_dimension_numbers<[1], [0], [0], [1], [0, 0, 1, 1], [], []>} : vector<8x32xf32>, vector<32x128xf32>, vector<8x128xf32> -> vector<8x128xf32>
    %93 = arith.addf %91, %92 : vector<8x128xf32>
    %94 = math.tanh %93 : vector<8x128xf32>
    %95 = arith.negf %93 : vector<8x128xf32>
    %96 = math.exp %95 : vector<8x128xf32>
    %cst_18 = arith.constant 1.000000e+00 : f32
    %97 = vector.broadcast %cst_18 : f32 to vector<8x128xf32>
    %98 = arith.addf %97, %96 : vector<8x128xf32>
    %99 = arith.divf %97, %98 : vector<8x128xf32>
    %100 = arith.select %5, %94, %99 : vector<8x128xi1>, vector<8x128xf32>
    %101 = vector.extract_strided_slice %100 {offsets = [0, 0], sizes = [8, 32], strides = [1, 1]} : vector<8x128xf32> to vector<8x32xf32>
    %102 = vector.extract_strided_slice %100 {offsets = [0, 32], sizes = [8, 32], strides = [1, 1]} : vector<8x128xf32> to vector<8x32xf32>
    %103 = vector.extract_strided_slice %100 {offsets = [0, 64], sizes = [8, 32], strides = [1, 1]} : vector<8x128xf32> to vector<8x32xf32>
    %104 = vector.extract_strided_slice %100 {offsets = [0, 96], sizes = [8, 32], strides = [1, 1]} : vector<8x128xf32> to vector<8x32xf32>
    %105 = arith.mulf %102, %88 : vector<8x32xf32>
    %106 = arith.mulf %101, %103 : vector<8x32xf32>
    %107 = arith.addf %105, %106 : vector<8x32xf32>
    %108 = math.tanh %107 : vector<8x32xf32>
    %109 = arith.mulf %104, %108 : vector<8x32xf32>
    %110 = vector.extract_strided_slice %12 {offsets = [40, 0], sizes = [8, 128], strides = [1, 1]} : vector<64x128xf32> to vector<8x128xf32>
    %cst_19 = arith.constant dense<0.000000e+00> : vector<8x128xf32>
    %111 = tpu.matmul %109, %8, %cst_19 {dimension_numbers = #tpu.dot_dimension_numbers<[1], [0], [0], [1], [0, 0, 1, 1], [], []>} : vector<8x32xf32>, vector<32x128xf32>, vector<8x128xf32> -> vector<8x128xf32>
    %112 = arith.addf %110, %111 : vector<8x128xf32>
    %113 = math.tanh %112 : vector<8x128xf32>
    %114 = arith.negf %112 : vector<8x128xf32>
    %115 = math.exp %114 : vector<8x128xf32>
    %cst_20 = arith.constant 1.000000e+00 : f32
    %116 = vector.broadcast %cst_20 : f32 to vector<8x128xf32>
    %117 = arith.addf %116, %115 : vector<8x128xf32>
    %118 = arith.divf %116, %117 : vector<8x128xf32>
    %119 = arith.select %5, %113, %118 : vector<8x128xi1>, vector<8x128xf32>
    %120 = vector.extract_strided_slice %119 {offsets = [0, 0], sizes = [8, 32], strides = [1, 1]} : vector<8x128xf32> to vector<8x32xf32>
    %121 = vector.extract_strided_slice %119 {offsets = [0, 32], sizes = [8, 32], strides = [1, 1]} : vector<8x128xf32> to vector<8x32xf32>
    %122 = vector.extract_strided_slice %119 {offsets = [0, 64], sizes = [8, 32], strides = [1, 1]} : vector<8x128xf32> to vector<8x32xf32>
    %123 = vector.extract_strided_slice %119 {offsets = [0, 96], sizes = [8, 32], strides = [1, 1]} : vector<8x128xf32> to vector<8x32xf32>
    %124 = arith.mulf %121, %107 : vector<8x32xf32>
    %125 = arith.mulf %120, %122 : vector<8x32xf32>
    %126 = arith.addf %124, %125 : vector<8x32xf32>
    %127 = math.tanh %126 : vector<8x32xf32>
    %128 = arith.mulf %123, %127 : vector<8x32xf32>
    %129 = vector.extract_strided_slice %12 {offsets = [48, 0], sizes = [8, 128], strides = [1, 1]} : vector<64x128xf32> to vector<8x128xf32>
    %cst_21 = arith.constant dense<0.000000e+00> : vector<8x128xf32>
    %130 = tpu.matmul %128, %8, %cst_21 {dimension_numbers = #tpu.dot_dimension_numbers<[1], [0], [0], [1], [0, 0, 1, 1], [], []>} : vector<8x32xf32>, vector<32x128xf32>, vector<8x128xf32> -> vector<8x128xf32>
    %131 = arith.addf %129, %130 : vector<8x128xf32>
    %132 = math.tanh %131 : vector<8x128xf32>
    %133 = arith.negf %131 : vector<8x128xf32>
    %134 = math.exp %133 : vector<8x128xf32>
    %cst_22 = arith.constant 1.000000e+00 : f32
    %135 = vector.broadcast %cst_22 : f32 to vector<8x128xf32>
    %136 = arith.addf %135, %134 : vector<8x128xf32>
    %137 = arith.divf %135, %136 : vector<8x128xf32>
    %138 = arith.select %5, %132, %137 : vector<8x128xi1>, vector<8x128xf32>
    %139 = vector.extract_strided_slice %138 {offsets = [0, 0], sizes = [8, 32], strides = [1, 1]} : vector<8x128xf32> to vector<8x32xf32>
    %140 = vector.extract_strided_slice %138 {offsets = [0, 32], sizes = [8, 32], strides = [1, 1]} : vector<8x128xf32> to vector<8x32xf32>
    %141 = vector.extract_strided_slice %138 {offsets = [0, 64], sizes = [8, 32], strides = [1, 1]} : vector<8x128xf32> to vector<8x32xf32>
    %142 = vector.extract_strided_slice %138 {offsets = [0, 96], sizes = [8, 32], strides = [1, 1]} : vector<8x128xf32> to vector<8x32xf32>
    %143 = arith.mulf %140, %126 : vector<8x32xf32>
    %144 = arith.mulf %139, %141 : vector<8x32xf32>
    %145 = arith.addf %143, %144 : vector<8x32xf32>
    %146 = math.tanh %145 : vector<8x32xf32>
    %147 = arith.mulf %142, %146 : vector<8x32xf32>
    %148 = vector.extract_strided_slice %12 {offsets = [56, 0], sizes = [8, 128], strides = [1, 1]} : vector<64x128xf32> to vector<8x128xf32>
    %cst_23 = arith.constant dense<0.000000e+00> : vector<8x128xf32>
    %149 = tpu.matmul %147, %8, %cst_23 {dimension_numbers = #tpu.dot_dimension_numbers<[1], [0], [0], [1], [0, 0, 1, 1], [], []>} : vector<8x32xf32>, vector<32x128xf32>, vector<8x128xf32> -> vector<8x128xf32>
    %150 = arith.addf %148, %149 : vector<8x128xf32>
    %151 = math.tanh %150 : vector<8x128xf32>
    %152 = arith.negf %150 : vector<8x128xf32>
    %153 = math.exp %152 : vector<8x128xf32>
    %cst_24 = arith.constant 1.000000e+00 : f32
    %154 = vector.broadcast %cst_24 : f32 to vector<8x128xf32>
    %155 = arith.addf %154, %153 : vector<8x128xf32>
    %156 = arith.divf %154, %155 : vector<8x128xf32>
    %157 = arith.select %5, %151, %156 : vector<8x128xi1>, vector<8x128xf32>
    %158 = vector.extract_strided_slice %157 {offsets = [0, 0], sizes = [8, 32], strides = [1, 1]} : vector<8x128xf32> to vector<8x32xf32>
    %159 = vector.extract_strided_slice %157 {offsets = [0, 32], sizes = [8, 32], strides = [1, 1]} : vector<8x128xf32> to vector<8x32xf32>
    %160 = vector.extract_strided_slice %157 {offsets = [0, 64], sizes = [8, 32], strides = [1, 1]} : vector<8x128xf32> to vector<8x32xf32>
    %161 = vector.extract_strided_slice %157 {offsets = [0, 96], sizes = [8, 32], strides = [1, 1]} : vector<8x128xf32> to vector<8x32xf32>
    %162 = arith.mulf %159, %145 : vector<8x32xf32>
    %163 = arith.mulf %158, %160 : vector<8x32xf32>
    %164 = arith.addf %162, %163 : vector<8x32xf32>
    %165 = math.tanh %164 : vector<8x32xf32>
    %166 = arith.mulf %161, %165 : vector<8x32xf32>
    %167 = tpu.concatenate %33, %52, %71, %90, %109, %128, %147, %166 in 0 : vector<8x32xf32>, vector<8x32xf32>, vector<8x32xf32>, vector<8x32xf32>, vector<8x32xf32>, vector<8x32xf32>, vector<8x32xf32>, vector<8x32xf32> -> vector<64x32xf32>
    %c0_25 = arith.constant 0 : index
    %c0_26 = arith.constant 0 : index
    %168 = vector.load %arg5[%c0_25, %c0_26] : memref<32x128xf32, #tpu.memory_space<vmem>>, vector<32x128xf32>
    %c0_27 = arith.constant 0 : index
    %c0_28 = arith.constant 0 : index
    %169 = vector.load %arg6[%c0_27, %c0_28] : memref<32x128xf32, #tpu.memory_space<vmem>>, vector<32x128xf32>
    %c0_29 = arith.constant 0 : index
    %c0_30 = arith.constant 0 : index
    %170 = vector.load %arg7[%c0_29, %c0_30] : memref<1x128xf32, #tpu.memory_space<vmem>>, vector<1x128xf32>
    %cst_31 = arith.constant dense<0.000000e+00> : vector<64x128xf32>
    %171 = tpu.matmul %167, %168, %cst_31 {dimension_numbers = #tpu.dot_dimension_numbers<[1], [0], [0], [1], [0, 0, 1, 1], [], []>} : vector<64x32xf32>, vector<32x128xf32>, vector<64x128xf32> -> vector<64x128xf32>
    %172 = vector.broadcast %170 : vector<1x128xf32> to vector<64x128xf32>
    %173 = arith.addf %171, %172 : vector<64x128xf32>
    %cst_32 = arith.constant 0.000000e+00 : f32
    %174 = vector.broadcast %cst_32 : f32 to vector<8x32xf32>
    %cst_33 = arith.constant 0.000000e+00 : f32
    %175 = vector.broadcast %cst_33 : f32 to vector<8x32xf32>
    %176 = vector.extract_strided_slice %173 {offsets = [0, 0], sizes = [8, 128], strides = [1, 1]} : vector<64x128xf32> to vector<8x128xf32>
    %cst_34 = arith.constant dense<0.000000e+00> : vector<8x128xf32>
    %177 = tpu.matmul %174, %169, %cst_34 {dimension_numbers = #tpu.dot_dimension_numbers<[1], [0], [0], [1], [0, 0, 1, 1], [], []>} : vector<8x32xf32>, vector<32x128xf32>, vector<8x128xf32> -> vector<8x128xf32>
    %178 = arith.addf %176, %177 : vector<8x128xf32>
    %179 = math.tanh %178 : vector<8x128xf32>
    %180 = arith.negf %178 : vector<8x128xf32>
    %181 = math.exp %180 : vector<8x128xf32>
    %cst_35 = arith.constant 1.000000e+00 : f32
    %182 = vector.broadcast %cst_35 : f32 to vector<8x128xf32>
    %183 = arith.addf %182, %181 : vector<8x128xf32>
    %184 = arith.divf %182, %183 : vector<8x128xf32>
    %185 = arith.select %5, %179, %184 : vector<8x128xi1>, vector<8x128xf32>
    %186 = vector.extract_strided_slice %185 {offsets = [0, 0], sizes = [8, 32], strides = [1, 1]} : vector<8x128xf32> to vector<8x32xf32>
    %187 = vector.extract_strided_slice %185 {offsets = [0, 32], sizes = [8, 32], strides = [1, 1]} : vector<8x128xf32> to vector<8x32xf32>
    %188 = vector.extract_strided_slice %185 {offsets = [0, 64], sizes = [8, 32], strides = [1, 1]} : vector<8x128xf32> to vector<8x32xf32>
    %189 = vector.extract_strided_slice %185 {offsets = [0, 96], sizes = [8, 32], strides = [1, 1]} : vector<8x128xf32> to vector<8x32xf32>
    %190 = arith.mulf %187, %175 : vector<8x32xf32>
    %191 = arith.mulf %186, %188 : vector<8x32xf32>
    %192 = arith.addf %190, %191 : vector<8x32xf32>
    %193 = math.tanh %192 : vector<8x32xf32>
    %194 = arith.mulf %189, %193 : vector<8x32xf32>
    %195 = vector.extract_strided_slice %173 {offsets = [8, 0], sizes = [8, 128], strides = [1, 1]} : vector<64x128xf32> to vector<8x128xf32>
    %cst_36 = arith.constant dense<0.000000e+00> : vector<8x128xf32>
    %196 = tpu.matmul %194, %169, %cst_36 {dimension_numbers = #tpu.dot_dimension_numbers<[1], [0], [0], [1], [0, 0, 1, 1], [], []>} : vector<8x32xf32>, vector<32x128xf32>, vector<8x128xf32> -> vector<8x128xf32>
    %197 = arith.addf %195, %196 : vector<8x128xf32>
    %198 = math.tanh %197 : vector<8x128xf32>
    %199 = arith.negf %197 : vector<8x128xf32>
    %200 = math.exp %199 : vector<8x128xf32>
    %cst_37 = arith.constant 1.000000e+00 : f32
    %201 = vector.broadcast %cst_37 : f32 to vector<8x128xf32>
    %202 = arith.addf %201, %200 : vector<8x128xf32>
    %203 = arith.divf %201, %202 : vector<8x128xf32>
    %204 = arith.select %5, %198, %203 : vector<8x128xi1>, vector<8x128xf32>
    %205 = vector.extract_strided_slice %204 {offsets = [0, 0], sizes = [8, 32], strides = [1, 1]} : vector<8x128xf32> to vector<8x32xf32>
    %206 = vector.extract_strided_slice %204 {offsets = [0, 32], sizes = [8, 32], strides = [1, 1]} : vector<8x128xf32> to vector<8x32xf32>
    %207 = vector.extract_strided_slice %204 {offsets = [0, 64], sizes = [8, 32], strides = [1, 1]} : vector<8x128xf32> to vector<8x32xf32>
    %208 = vector.extract_strided_slice %204 {offsets = [0, 96], sizes = [8, 32], strides = [1, 1]} : vector<8x128xf32> to vector<8x32xf32>
    %209 = arith.mulf %206, %192 : vector<8x32xf32>
    %210 = arith.mulf %205, %207 : vector<8x32xf32>
    %211 = arith.addf %209, %210 : vector<8x32xf32>
    %212 = math.tanh %211 : vector<8x32xf32>
    %213 = arith.mulf %208, %212 : vector<8x32xf32>
    %214 = vector.extract_strided_slice %173 {offsets = [16, 0], sizes = [8, 128], strides = [1, 1]} : vector<64x128xf32> to vector<8x128xf32>
    %cst_38 = arith.constant dense<0.000000e+00> : vector<8x128xf32>
    %215 = tpu.matmul %213, %169, %cst_38 {dimension_numbers = #tpu.dot_dimension_numbers<[1], [0], [0], [1], [0, 0, 1, 1], [], []>} : vector<8x32xf32>, vector<32x128xf32>, vector<8x128xf32> -> vector<8x128xf32>
    %216 = arith.addf %214, %215 : vector<8x128xf32>
    %217 = math.tanh %216 : vector<8x128xf32>
    %218 = arith.negf %216 : vector<8x128xf32>
    %219 = math.exp %218 : vector<8x128xf32>
    %cst_39 = arith.constant 1.000000e+00 : f32
    %220 = vector.broadcast %cst_39 : f32 to vector<8x128xf32>
    %221 = arith.addf %220, %219 : vector<8x128xf32>
    %222 = arith.divf %220, %221 : vector<8x128xf32>
    %223 = arith.select %5, %217, %222 : vector<8x128xi1>, vector<8x128xf32>
    %224 = vector.extract_strided_slice %223 {offsets = [0, 0], sizes = [8, 32], strides = [1, 1]} : vector<8x128xf32> to vector<8x32xf32>
    %225 = vector.extract_strided_slice %223 {offsets = [0, 32], sizes = [8, 32], strides = [1, 1]} : vector<8x128xf32> to vector<8x32xf32>
    %226 = vector.extract_strided_slice %223 {offsets = [0, 64], sizes = [8, 32], strides = [1, 1]} : vector<8x128xf32> to vector<8x32xf32>
    %227 = vector.extract_strided_slice %223 {offsets = [0, 96], sizes = [8, 32], strides = [1, 1]} : vector<8x128xf32> to vector<8x32xf32>
    %228 = arith.mulf %225, %211 : vector<8x32xf32>
    %229 = arith.mulf %224, %226 : vector<8x32xf32>
    %230 = arith.addf %228, %229 : vector<8x32xf32>
    %231 = math.tanh %230 : vector<8x32xf32>
    %232 = arith.mulf %227, %231 : vector<8x32xf32>
    %233 = vector.extract_strided_slice %173 {offsets = [24, 0], sizes = [8, 128], strides = [1, 1]} : vector<64x128xf32> to vector<8x128xf32>
    %cst_40 = arith.constant dense<0.000000e+00> : vector<8x128xf32>
    %234 = tpu.matmul %232, %169, %cst_40 {dimension_numbers = #tpu.dot_dimension_numbers<[1], [0], [0], [1], [0, 0, 1, 1], [], []>} : vector<8x32xf32>, vector<32x128xf32>, vector<8x128xf32> -> vector<8x128xf32>
    %235 = arith.addf %233, %234 : vector<8x128xf32>
    %236 = math.tanh %235 : vector<8x128xf32>
    %237 = arith.negf %235 : vector<8x128xf32>
    %238 = math.exp %237 : vector<8x128xf32>
    %cst_41 = arith.constant 1.000000e+00 : f32
    %239 = vector.broadcast %cst_41 : f32 to vector<8x128xf32>
    %240 = arith.addf %239, %238 : vector<8x128xf32>
    %241 = arith.divf %239, %240 : vector<8x128xf32>
    %242 = arith.select %5, %236, %241 : vector<8x128xi1>, vector<8x128xf32>
    %243 = vector.extract_strided_slice %242 {offsets = [0, 0], sizes = [8, 32], strides = [1, 1]} : vector<8x128xf32> to vector<8x32xf32>
    %244 = vector.extract_strided_slice %242 {offsets = [0, 32], sizes = [8, 32], strides = [1, 1]} : vector<8x128xf32> to vector<8x32xf32>
    %245 = vector.extract_strided_slice %242 {offsets = [0, 64], sizes = [8, 32], strides = [1, 1]} : vector<8x128xf32> to vector<8x32xf32>
    %246 = vector.extract_strided_slice %242 {offsets = [0, 96], sizes = [8, 32], strides = [1, 1]} : vector<8x128xf32> to vector<8x32xf32>
    %247 = arith.mulf %244, %230 : vector<8x32xf32>
    %248 = arith.mulf %243, %245 : vector<8x32xf32>
    %249 = arith.addf %247, %248 : vector<8x32xf32>
    %250 = math.tanh %249 : vector<8x32xf32>
    %251 = arith.mulf %246, %250 : vector<8x32xf32>
    %252 = vector.extract_strided_slice %173 {offsets = [32, 0], sizes = [8, 128], strides = [1, 1]} : vector<64x128xf32> to vector<8x128xf32>
    %cst_42 = arith.constant dense<0.000000e+00> : vector<8x128xf32>
    %253 = tpu.matmul %251, %169, %cst_42 {dimension_numbers = #tpu.dot_dimension_numbers<[1], [0], [0], [1], [0, 0, 1, 1], [], []>} : vector<8x32xf32>, vector<32x128xf32>, vector<8x128xf32> -> vector<8x128xf32>
    %254 = arith.addf %252, %253 : vector<8x128xf32>
    %255 = math.tanh %254 : vector<8x128xf32>
    %256 = arith.negf %254 : vector<8x128xf32>
    %257 = math.exp %256 : vector<8x128xf32>
    %cst_43 = arith.constant 1.000000e+00 : f32
    %258 = vector.broadcast %cst_43 : f32 to vector<8x128xf32>
    %259 = arith.addf %258, %257 : vector<8x128xf32>
    %260 = arith.divf %258, %259 : vector<8x128xf32>
    %261 = arith.select %5, %255, %260 : vector<8x128xi1>, vector<8x128xf32>
    %262 = vector.extract_strided_slice %261 {offsets = [0, 0], sizes = [8, 32], strides = [1, 1]} : vector<8x128xf32> to vector<8x32xf32>
    %263 = vector.extract_strided_slice %261 {offsets = [0, 32], sizes = [8, 32], strides = [1, 1]} : vector<8x128xf32> to vector<8x32xf32>
    %264 = vector.extract_strided_slice %261 {offsets = [0, 64], sizes = [8, 32], strides = [1, 1]} : vector<8x128xf32> to vector<8x32xf32>
    %265 = vector.extract_strided_slice %261 {offsets = [0, 96], sizes = [8, 32], strides = [1, 1]} : vector<8x128xf32> to vector<8x32xf32>
    %266 = arith.mulf %263, %249 : vector<8x32xf32>
    %267 = arith.mulf %262, %264 : vector<8x32xf32>
    %268 = arith.addf %266, %267 : vector<8x32xf32>
    %269 = math.tanh %268 : vector<8x32xf32>
    %270 = arith.mulf %265, %269 : vector<8x32xf32>
    %271 = vector.extract_strided_slice %173 {offsets = [40, 0], sizes = [8, 128], strides = [1, 1]} : vector<64x128xf32> to vector<8x128xf32>
    %cst_44 = arith.constant dense<0.000000e+00> : vector<8x128xf32>
    %272 = tpu.matmul %270, %169, %cst_44 {dimension_numbers = #tpu.dot_dimension_numbers<[1], [0], [0], [1], [0, 0, 1, 1], [], []>} : vector<8x32xf32>, vector<32x128xf32>, vector<8x128xf32> -> vector<8x128xf32>
    %273 = arith.addf %271, %272 : vector<8x128xf32>
    %274 = math.tanh %273 : vector<8x128xf32>
    %275 = arith.negf %273 : vector<8x128xf32>
    %276 = math.exp %275 : vector<8x128xf32>
    %cst_45 = arith.constant 1.000000e+00 : f32
    %277 = vector.broadcast %cst_45 : f32 to vector<8x128xf32>
    %278 = arith.addf %277, %276 : vector<8x128xf32>
    %279 = arith.divf %277, %278 : vector<8x128xf32>
    %280 = arith.select %5, %274, %279 : vector<8x128xi1>, vector<8x128xf32>
    %281 = vector.extract_strided_slice %280 {offsets = [0, 0], sizes = [8, 32], strides = [1, 1]} : vector<8x128xf32> to vector<8x32xf32>
    %282 = vector.extract_strided_slice %280 {offsets = [0, 32], sizes = [8, 32], strides = [1, 1]} : vector<8x128xf32> to vector<8x32xf32>
    %283 = vector.extract_strided_slice %280 {offsets = [0, 64], sizes = [8, 32], strides = [1, 1]} : vector<8x128xf32> to vector<8x32xf32>
    %284 = vector.extract_strided_slice %280 {offsets = [0, 96], sizes = [8, 32], strides = [1, 1]} : vector<8x128xf32> to vector<8x32xf32>
    %285 = arith.mulf %282, %268 : vector<8x32xf32>
    %286 = arith.mulf %281, %283 : vector<8x32xf32>
    %287 = arith.addf %285, %286 : vector<8x32xf32>
    %288 = math.tanh %287 : vector<8x32xf32>
    %289 = arith.mulf %284, %288 : vector<8x32xf32>
    %290 = vector.extract_strided_slice %173 {offsets = [48, 0], sizes = [8, 128], strides = [1, 1]} : vector<64x128xf32> to vector<8x128xf32>
    %cst_46 = arith.constant dense<0.000000e+00> : vector<8x128xf32>
    %291 = tpu.matmul %289, %169, %cst_46 {dimension_numbers = #tpu.dot_dimension_numbers<[1], [0], [0], [1], [0, 0, 1, 1], [], []>} : vector<8x32xf32>, vector<32x128xf32>, vector<8x128xf32> -> vector<8x128xf32>
    %292 = arith.addf %290, %291 : vector<8x128xf32>
    %293 = math.tanh %292 : vector<8x128xf32>
    %294 = arith.negf %292 : vector<8x128xf32>
    %295 = math.exp %294 : vector<8x128xf32>
    %cst_47 = arith.constant 1.000000e+00 : f32
    %296 = vector.broadcast %cst_47 : f32 to vector<8x128xf32>
    %297 = arith.addf %296, %295 : vector<8x128xf32>
    %298 = arith.divf %296, %297 : vector<8x128xf32>
    %299 = arith.select %5, %293, %298 : vector<8x128xi1>, vector<8x128xf32>
    %300 = vector.extract_strided_slice %299 {offsets = [0, 0], sizes = [8, 32], strides = [1, 1]} : vector<8x128xf32> to vector<8x32xf32>
    %301 = vector.extract_strided_slice %299 {offsets = [0, 32], sizes = [8, 32], strides = [1, 1]} : vector<8x128xf32> to vector<8x32xf32>
    %302 = vector.extract_strided_slice %299 {offsets = [0, 64], sizes = [8, 32], strides = [1, 1]} : vector<8x128xf32> to vector<8x32xf32>
    %303 = vector.extract_strided_slice %299 {offsets = [0, 96], sizes = [8, 32], strides = [1, 1]} : vector<8x128xf32> to vector<8x32xf32>
    %304 = arith.mulf %301, %287 : vector<8x32xf32>
    %305 = arith.mulf %300, %302 : vector<8x32xf32>
    %306 = arith.addf %304, %305 : vector<8x32xf32>
    %307 = math.tanh %306 : vector<8x32xf32>
    %308 = arith.mulf %303, %307 : vector<8x32xf32>
    %309 = vector.extract_strided_slice %173 {offsets = [56, 0], sizes = [8, 128], strides = [1, 1]} : vector<64x128xf32> to vector<8x128xf32>
    %cst_48 = arith.constant dense<0.000000e+00> : vector<8x128xf32>
    %310 = tpu.matmul %308, %169, %cst_48 {dimension_numbers = #tpu.dot_dimension_numbers<[1], [0], [0], [1], [0, 0, 1, 1], [], []>} : vector<8x32xf32>, vector<32x128xf32>, vector<8x128xf32> -> vector<8x128xf32>
    %311 = arith.addf %309, %310 : vector<8x128xf32>
    %312 = math.tanh %311 : vector<8x128xf32>
    %313 = arith.negf %311 : vector<8x128xf32>
    %314 = math.exp %313 : vector<8x128xf32>
    %cst_49 = arith.constant 1.000000e+00 : f32
    %315 = vector.broadcast %cst_49 : f32 to vector<8x128xf32>
    %316 = arith.addf %315, %314 : vector<8x128xf32>
    %317 = arith.divf %315, %316 : vector<8x128xf32>
    %318 = arith.select %5, %312, %317 : vector<8x128xi1>, vector<8x128xf32>
    %319 = vector.extract_strided_slice %318 {offsets = [0, 0], sizes = [8, 32], strides = [1, 1]} : vector<8x128xf32> to vector<8x32xf32>
    %320 = vector.extract_strided_slice %318 {offsets = [0, 32], sizes = [8, 32], strides = [1, 1]} : vector<8x128xf32> to vector<8x32xf32>
    %321 = vector.extract_strided_slice %318 {offsets = [0, 64], sizes = [8, 32], strides = [1, 1]} : vector<8x128xf32> to vector<8x32xf32>
    %322 = vector.extract_strided_slice %318 {offsets = [0, 96], sizes = [8, 32], strides = [1, 1]} : vector<8x128xf32> to vector<8x32xf32>
    %323 = arith.mulf %320, %306 : vector<8x32xf32>
    %324 = arith.mulf %319, %321 : vector<8x32xf32>
    %325 = arith.addf %323, %324 : vector<8x32xf32>
    %326 = math.tanh %325 : vector<8x32xf32>
    %327 = arith.mulf %322, %326 : vector<8x32xf32>
    %c0_50 = arith.constant 0 : index
    %c0_51 = arith.constant 0 : index
    %328 = vector.load %arg8[%c0_50, %c0_51] : memref<2x32xf32, #tpu.memory_space<vmem>>, vector<1x32xf32>
    %c1 = arith.constant 1 : index
    %c0_52 = arith.constant 0 : index
    %329 = vector.load %arg8[%c1, %c0_52] : memref<2x32xf32, #tpu.memory_space<vmem>>, vector<1x32xf32>
    %330 = vector.broadcast %328 : vector<1x32xf32> to vector<8x32xf32>
    %331 = arith.mulf %327, %330 : vector<8x32xf32>
    %cst_53 = arith.constant dense<0.000000e+00> : vector<8xf32>
    %332 = vector.multi_reduction <add>, %331, %cst_53 [1] : vector<8x32xf32> to vector<8xf32>
    %333 = vector.shape_cast %332 : vector<8xf32> to vector<8x1xf32>
    %334 = vector.broadcast %329 : vector<1x32xf32> to vector<8x32xf32>
    %335 = arith.mulf %327, %334 : vector<8x32xf32>
    %cst_54 = arith.constant dense<0.000000e+00> : vector<8xf32>
    %336 = vector.multi_reduction <add>, %335, %cst_54 [1] : vector<8x32xf32> to vector<8xf32>
    %337 = vector.shape_cast %336 : vector<8xf32> to vector<8x1xf32>
    %338 = tpu.concatenate %333, %337 in 1 : vector<8x1xf32>, vector<8x1xf32> -> vector<8x2xf32>
    %c0_55 = arith.constant 0 : index
    %c0_56 = arith.constant 0 : index
    %339 = vector.load %arg9[%c0_55, %c0_56] : memref<1x2xf32, #tpu.memory_space<vmem>>, vector<1x2xf32>
    %340 = vector.broadcast %339 : vector<1x2xf32> to vector<8x2xf32>
    %341 = arith.addf %338, %340 : vector<8x2xf32>
    %cst_57 = arith.constant dense<0xFF800000> : vector<8xf32>
    %342 = vector.multi_reduction <maximumf>, %341, %cst_57 [1] : vector<8x2xf32> to vector<8xf32>
    %343 = vector.shape_cast %342 : vector<8xf32> to vector<8x1xf32>
    %344 = vector.broadcast %343 : vector<8x1xf32> to vector<8x2xf32>
    %345 = arith.subf %341, %344 : vector<8x2xf32>
    %346 = math.exp %345 : vector<8x2xf32>
    %cst_58 = arith.constant dense<0.000000e+00> : vector<8xf32>
    %347 = vector.multi_reduction <add>, %346, %cst_58 [1] : vector<8x2xf32> to vector<8xf32>
    %348 = vector.shape_cast %347 : vector<8xf32> to vector<8x1xf32>
    %349 = vector.broadcast %348 : vector<8x1xf32> to vector<8x2xf32>
    %350 = arith.divf %346, %349 : vector<8x2xf32>
    %c0_59 = arith.constant 0 : index
    %c0_60 = arith.constant 0 : index
    %351 = vector.load %arg10[%c0_59, %c0_60] : memref<8x2xf32, #tpu.memory_space<vmem>>, vector<8x2xf32>
    tpu.vector_store %arg10[%c0_59, %c0_60], %350 {strides = array<i32>} : memref<8x2xf32, #tpu.memory_space<vmem>>, vector<8x2xf32>,
    return
  }
  func.func @transform_0(%arg0: i32) -> (i32, i32) {
    %c0_i32 = arith.constant 0 : i32
    %c0_i32_0 = arith.constant 0 : i32
    %c0_i32_1 = arith.constant 0 : i32
    return %c0_i32, %c0_i32_0 : i32, i32
  }
  func.func @transform_1(%arg0: i32) -> (i32, i32) {
    %c0_i32 = arith.constant 0 : i32
    %c0_i32_0 = arith.constant 0 : i32
    %c0_i32_1 = arith.constant 0 : i32
    return %c0_i32, %c0_i32_0 : i32, i32
  }
  func.func @transform_2(%arg0: i32) -> (i32, i32) {
    %c0_i32 = arith.constant 0 : i32
    %c0_i32_0 = arith.constant 0 : i32
    %c0_i32_1 = arith.constant 0 : i32
    return %c0_i32, %c0_i32_0 : i32, i32
  }
  func.func @transform_3(%arg0: i32) -> (i32, i32) {
    %c0_i32 = arith.constant 0 : i32
    %c0_i32_0 = arith.constant 0 : i32
    %c0_i32_1 = arith.constant 0 : i32
    return %c0_i32, %c0_i32_0 : i32, i32
  }
  func.func @transform_4(%arg0: i32) -> (i32, i32) {
    %c0_i32 = arith.constant 0 : i32
    %c0_i32_0 = arith.constant 0 : i32
    %c0_i32_1 = arith.constant 0 : i32
    return %c0_i32, %c0_i32_0 : i32, i32
  }
  func.func @transform_5(%arg0: i32) -> (i32, i32) {
    %c0_i32 = arith.constant 0 : i32
    %c0_i32_0 = arith.constant 0 : i32
    %c0_i32_1 = arith.constant 0 : i32
    return %c0_i32, %c0_i32_0 : i32, i32
  }
  func.func @transform_6(%arg0: i32) -> (i32, i32) {
    %c0_i32 = arith.constant 0 : i32
    %c0_i32_0 = arith.constant 0 : i32
    %c0_i32_1 = arith.constant 0 : i32
    return %c0_i32, %c0_i32_0 : i32, i32
  }
  func.func @transform_7(%arg0: i32) -> (i32, i32) {
    %c0_i32 = arith.constant 0 : i32
    %c0_i32_0 = arith.constant 0 : i32
    %c0_i32_1 = arith.constant 0 : i32
    return %c0_i32, %c0_i32_0 : i32, i32
  }
  func.func @transform_8(%arg0: i32) -> (i32, i32) {
    %c0_i32 = arith.constant 0 : i32
    %c0_i32_0 = arith.constant 0 : i32
    %c0_i32_1 = arith.constant 0 : i32
    return %c0_i32, %c0_i32_0 : i32, i32
  }
  func.func @transform_9(%arg0: i32) -> (i32, i32) {
    %c0_i32 = arith.constant 0 : i32
    %c0_i32_0 = arith.constant 0 : i32
    %c0_i32_1 = arith.constant 0 : i32
    return %c0_i32, %c0_i32_0 : i32, i32
  }
}

</mosaic_0001>

<bundles_post_ra>
// kernel: bert_net_forward.1
= control target key start
LH: loop header
LB: loop body
LE: loop exit
PB: predicated region body
PF: predicated region fallthrough
CT: control target
= control target key end

     0   :  { %v2493_v2 = vmov 0.0   ;;  %vm2494_vm0 = vmmov 0   ;;  %vm60_vm1 = vcmask 261120   ;;  %v32_v21 = vlaneseq  ;;  %s2496_s29 = smov 32   ;;  %s2497_s15 = smov 96   ;;  %s3019_s1 = inlined_call_operand.vmem [shape: f32[32,128], index: 1, kind: input, shape index: {}]   ;;  %s3020_s2 = inlined_call_operand.vmem [shape: f32[32,128], index: 2, kind: input, shape index: {}]   ;;  %s3021_s0 = inlined_call_operand.vmem [shape: f32[64,32], index: 0, kind: input, shape index: {}]   ;;  %s3022_s3 = inlined_call_operand.vmem [shape: f32[1,128], index: 3, kind: input, shape index: {}]   ;;  %s3023_s4 = inlined_call_operand.vmem [shape: f32[32,128], index: 4, kind: input, shape index: {}]   ;;  %s3024_s5 = inlined_call_operand.vmem [shape: f32[32,128], index: 5, kind: input, shape index: {}]   ;;  %s3025_s6 = inlined_call_operand.vmem [shape: f32[1,128], index: 6, kind: input, shape index: {}]   ;;  %s3026_s7 = inlined_call_operand.vmem [shape: f32[2,32], index: 7, kind: input, shape index: {}]   ;;  %s3027_s8 = inlined_call_operand.vmem [shape: f32[1,2], index: 8, kind: input, shape index: {}]   ;;  %s3028_s9 = inlined_call_operand.vmem [shape: f32[8,2], index: 9, kind: output, shape index: {}]  }
   0x1   :  { %v48_v0 = vld [vmem:[%s3019_s1 + $0x18] sm:$0xff]  ;;  %v47_v1 = vld [vmem:[%s3019_s1 + $0x10] sm:$0xff]  ;;  %2160 = vmatprep.subr.mxu1 %v2493_v2  ;;  %2168 = vmatprep.mubr.msk.f32.mxu1 %vm2494_vm0, %v2493_v2  ;;  %v46_v5 = vld [vmem:[%s3019_s1 + $0x8] sm:$0xff]  ;;  %vm1958_vm5 = vcmask 7168   ;;  %vm1968_vm6 = vcmask 15360  }
   0x2   :  { %v2558_v3 = vld [vmem:[%s3020_s2 + $0x18] sm:$0xff]  ;;  %2140 = vmatprep.subr.mxu0 %v48_v0  ;;  %v2566_v4 = vld [vmem:[%s3020_s2 + $0x10] sm:$0xff]  ;;  %v37_v6 = vld [vmem:[%s3021_s0] sm:$0xff]  ;;  %v33_v22 = vand.u32 127, %v32_v21 }
   0x3   :  { %2161 = vmatpush3.msra.mxu1 %v2558_v3  ;;  %2141 = vmatpush3.msra.mxu0 %v48_v0  ;;  %v2579_v7 = vld [vmem:[%s3020_s2 + $0x8] sm:$0xff]  ;;  %v45_v8 = vld [vmem:[%s3019_s1] sm:$0xff]  ;;  %v39_v51 = vld [vmem:[%s3021_s0 + $0x10] sm:$0xff] }
   0x4   :  { %2162 = vmatprep.subr.mxu1 %v2493_v2  ;;  %2142 = vmatprep.subr.mxu0 %v47_v1  ;;  %v2589_v9 = vld [vmem:[%s3020_s2] sm:$0xff]  ;;  %v38_v10 = vld [vmem:[%s3021_s0 + $0x8] sm:$0xff]  ;;  %vm34_vm2 = vcmp.ge.s32.totalorder %v33_v22, 64  ;;  %vm35_vm3 = vcmp.lt.s32.totalorder %v33_v22, 96  ;;  %v40_v52 = vld [vmem:[%s3021_s0 + $0x18] sm:$0xff] }
   0x5   :  { %2163 = vmatpush3.msra.mxu1 %v2566_v4  ;;  %2143 = vmatpush3.msra.mxu0 %v47_v1  ;;  %v2622_v13 = vld [vmem:[%s3022_s3] ss:$0 sm:$0xff]  ;;  %vm2625_vm4 = vmand %vm34_vm2, %vm35_vm3  ;;  %s2495_s3 = smov 64   ;;  %v42_v54 = vld [vmem:[%s3021_s0 + $0x28] sm:$0xff] }
   0x6   :  { %2164 = vmatprep.subr.mxu1 %v2493_v2  ;;  %2144 = vmatprep.subr.mxu0 %v46_v5  ;;  %v41_v53 = vld [vmem:[%s3021_s0 + $0x20] sm:$0xff]  ;;  %v43_v55 = vld [vmem:[%s3021_s0 + $0x30] sm:$0xff]  ;;  %v44_v56 = vld [vmem:[%s3021_s0 + $0x38] sm:$0xff] }
   0x7   :  { %2148 = vmatprep.mubr.msk.f32.mxu0 %vm60_vm1, %v37_v6  ;;  %2145 = vmatpush3.msra.mxu0 %v46_v5  ;;  %v2034_v23 = vld [vmem:[%s3026_s7 + $0x1] ss:$0 sm:$0xff] }
   0x8   :  { %2165 = vmatpush3.msra.mxu1 %v2579_v7  ;;  %2146 = vmatprep.subr.mxu0 %v45_v8 }
   0x9   :  { %2166 = vmatprep.subr.mxu1 %v2493_v2  ;;  %2147 = vmatpush3.msra.mxu0 %v45_v8 }
   0xa   :  { %2167 = vmatpush3.msra.mxu1 %v2589_v9  ;;  %2149 = vmatmul.mubr.msk.f32.vlgmr.msra.gmra.mxu0 %vm60_vm1, %v38_v10 }
   0xb   :  { %2169 = vmatmul.mubr.f32.vlgmr.msra.gmra.mxu1 %v2493_v2  ;;  %2171 = vmatprep.subr.mxu1 %v2493_v2 }
   0xc   :  { %2179 = vmatprep.mubr.msk.f32.mxu1 %vm2494_vm0, %v2493_v2  ;;  %2172 = vmatpush3.msra.mxu1 %v2558_v3 }
   0xd   :  { %2182 = vmatprep.subr.mxu0 %v2493_v2  ;;  %2173 = vmatprep.subr.mxu1 %v2493_v2 }
   0xe   :  { %2183 = vmatpush3.msra.mxu0 %v2558_v3  ;;  %2174 = vmatpush3.msra.mxu1 %v2566_v4 }
   0xf   :  { %2184 = vmatprep.subr.mxu0 %v2493_v2  ;;  %2175 = vmatprep.subr.mxu1 %v2493_v2 }
  0x10   :  { %2185 = vmatpush3.msra.mxu0 %v2566_v4  ;;  %2176 = vmatpush3.msra.mxu1 %v2579_v7 }
  0x11   :  { %2186 = vmatprep.subr.mxu0 %v2493_v2  ;;  %2177 = vmatprep.subr.mxu1 %v2493_v2 }
  0x12   :  { %2187 = vmatpush3.msra.mxu0 %v2579_v7  ;;  %2178 = vmatpush3.msra.mxu1 %v2589_v9 }
  0x13   :  { %2188 = vmatprep.subr.mxu0 %v2493_v2  ;;  %2193 = vmatprep.subr.mxu1 %v2493_v2 }
  0x14   :  { %2189 = vmatpush3.msra.mxu0 %v2589_v9  ;;  %2151 = vmatprep.mubr.msk.f32.mxu0 %vm60_vm1, %v39_v51 }
  0x15   :  { %2204 = vmatprep.subr.mxu0 %v2493_v2  ;;  %2152 = vmatmul.mubr.msk.f32.gmra.mxu0 %vm60_vm1, %v40_v52 }
  0x16   :  { %2154 = vmatprep.mubr.msk.f32.mxu0 %vm60_vm1, %v41_v53 }
  0x19   :  { %2155 = vmatmul.mubr.msk.f32.gmra.mxu0 %vm60_vm1, %v42_v54 }
  0x1a   :  { %2157 = vmatprep.mubr.msk.f32.mxu0 %vm60_vm1, %v43_v55 }
  0x1d   :  { %2158 = vmatmul.mubr.msk.f32.gmra.mxu0 %vm60_vm1, %v44_v56 }
  0x1e   :  { %2190 = vmatprep.mubr.msk.f32.mxu0 %vm2494_vm0, %v2493_v2 }
  0xca   :  { %v2150_v11 = vpop.f32.mrf.mxu0 }
  0xcb   :  { %v259_v12 = vpop.f32.mrf.mxu1  ;;  %v157_v36 = vadd.f32 %v2150_v11, %v2622_v13 }
  0xcc   :  { %v151_v14 = vpop.f32.mrf.mxu0 }
  0xcd   :  { %v2170_v15 = vpop.f32.mrf.mxu1  ;;  %v152_v16 = vadd.f32 %v2622_v13, %v151_v14 }
  0xcf   :  { %v263_v17 = vadd.f32 %v259_v12, %v152_v16 }
  0xd1   :  { %v1994_v18 = vmul.f32 -1.442695, %v263_v17 }
  0xd3   :  { %2361 = vpow2.f32 %v1994_v18 }
  0xd4   :  { %2363 = vtanh.f32 %v263_v17 }
  0xd5   :  { %v2153_v61 = vpop.f32.mrf.mxu0 }
  0xd7   :  { %v161_v62 = vpop.f32.mrf.mxu0 }
  0xd8   :  { %v162_v6 = vadd.f32 %v2622_v13, %v161_v62 }
  0xd9   :  { %v2696_v63 = vpop.f32.mrf.mxu0 }
  0xdb   :  { %v2698_v0 = vpop.f32.mrf.mxu0 }
  0xdd   :  { %v2700_v1 = vpop.f32.mrf.mxu0 }
  0xdf   :  { %v2702_v5 = vpop.f32.mrf.mxu0 }
  0xe0   :  { %v2362_v19 = vpop.eup %2361 }
  0xe1   :  { %v268_v20 = vadd.f32 1.0, %v2362_v19  ;;  %v2364_v24 = vpop.eup %2363 }
  0xe3   :  { %2365 = vrcp.f32 %v268_v20 }
  0xf0   :  { %v2366_v25 = vpop.eup %2365 }
  0xf1   :  { %v271_v26 = vsel %vm2625_vm4, %v2364_v24, %v2366_v25 }
  0xf2   :  { %274 = vrot.lane.b32.xlu0 %v271_v26, %s2495_s3  ;;  %v272_v29 = vmul.f32 0.0, %v271_v26 }
 0x164   :  { %v275_v27 = vpop.permute.xlu0 %274 }
 0x165   :  { %v277_v28 = vmul.f32 %v275_v27, %v271_v26 }
 0x167   :  { %279 = vrot.lane.b32.xlu0 %v277_v28, %s2496_s29 }
 0x1d9   :  { %v280_v30 = vpop.permute.xlu0 %279 }
 0x1da   :  { %v282_v31 = vadd.f32 %v280_v30, %v272_v29  ;;  %v167_v29 = vadd.f32 %v2153_v61, %v2622_v13 }
 0x1dc   :  { %2367 = vtanh.f32 %v282_v31 }
 0x1e9   :  { %v2368_v32 = vpop.eup %2367 }
 0x1ea   :  { %285 = vrot.lane.b32.xlu1 %v2368_v32, %s2495_s3 }
 0x25c   :  { %v286_v33 = vpop.permute.xlu1 %285 }
 0x25d   :  { %v288_v34 = vmul.f32 %v286_v33, %v271_v26 }
 0x25f   :  { %290 = vrot.lane.b32.xlu1 %v288_v34, %s2496_s29 }
 0x2d1   :  { %v2635_v35 = vpop.permute.xlu1 %290 }
 0x2d2   :  { %2180 = vmatmul.mubr.msk.f32.vlgmr.msra.gmra.mxu1 %vm60_vm1, %v2635_v35 }
 0x2d3   :  { %2194 = vmatpush3.msra.mxu1 %v2558_v3  ;;  %2201 = vmatprep.mubr.msk.f32.mxu1 %vm2494_vm0, %v2493_v2 }
 0x2d4   :  { %2195 = vmatprep.subr.mxu1 %v2493_v2 }
 0x2d5   :  { %2196 = vmatpush3.msra.mxu1 %v2566_v4 }
 0x2d6   :  { %2197 = vmatprep.subr.mxu1 %v2493_v2 }
 0x2d7   :  { %2198 = vmatpush3.msra.mxu1 %v2579_v7 }
 0x2d8   :  { %2199 = vmatprep.subr.mxu1 %v2493_v2 }
 0x2d9   :  { %2200 = vmatpush3.msra.mxu1 %v2589_v9 }
 0x2da   :  { %2215 = vmatprep.subr.mxu1 %v2493_v2 }
 0x392   :  { %v360_v37 = vpop.f32.mrf.mxu1 }
 0x393   :  { %v364_v38 = vadd.f32 %v360_v37, %v157_v36 }
 0x394   :  { %v2181_v39 = vpop.f32.mrf.mxu1 }
 0x395   :  { %v1996_v40 = vmul.f32 -1.442695, %v364_v38 }
 0x397   :  { %2369 = vpow2.f32 %v1996_v40 }
 0x398   :  { %2371 = vtanh.f32 %v364_v38 }
 0x3a4   :  { %v2370_v41 = vpop.eup %2369 }
 0x3a5   :  { %v369_v42 = vadd.f32 1.0, %v2370_v41  ;;  %v2372_v43 = vpop.eup %2371 }
 0x3a7   :  { %2373 = vrcp.f32 %v369_v42 }
 0x3b4   :  { %v2374_v44 = vpop.eup %2373 }
 0x3b5   :  { %v372_v45 = vsel %vm2625_vm4, %v2372_v43, %v2374_v44 }
 0x3b6   :  { %375 = vrot.lane.b32.xlu0 %v372_v45, %s2495_s3  ;;  %v373_v48 = vmul.f32 %v372_v45, %v282_v31 }
 0x428   :  { %v376_v46 = vpop.permute.xlu0 %375 }
 0x429   :  { %v378_v47 = vmul.f32 %v376_v46, %v372_v45 }
 0x42b   :  { %380 = vrot.lane.b32.xlu1 %v378_v47, %s2496_s29 }
 0x49d   :  { %v381_v49 = vpop.permute.xlu1 %380 }
 0x49e   :  { %v383_v50 = vadd.f32 %v381_v49, %v373_v48  ;;  %v172_v49 = vadd.f32 %v2622_v13, %v2698_v0 }
 0x4a0   :  { %2375 = vtanh.f32 %v383_v50 }
 0x4ad   :  { %v2376_v57 = vpop.eup %2375 }
 0x4ae   :  { %386 = vrot.lane.b32.xlu0 %v2376_v57, %s2495_s3 }
 0x520   :  { %v387_v58 = vpop.permute.xlu0 %386 }
 0x521   :  { %v389_v59 = vmul.f32 %v387_v58, %v372_v45 }
 0x523   :  { %391 = vrot.lane.b32.xlu1 %v389_v59, %s2496_s29 }
 0x595   :  { %v2682_v60 = vpop.permute.xlu1 %391 }
 0x596   :  { %2191 = vmatmul.mubr.msk.f32.vlgmr.msra.gmra.mxu0 %vm60_vm1, %v2682_v60 }
 0x597   :  { %2205 = vmatpush3.msra.mxu0 %v2558_v3  ;;  %2212 = vmatprep.mubr.msk.f32.mxu0 %vm2494_vm0, %v2493_v2 }
 0x598   :  { %2206 = vmatprep.subr.mxu0 %v2493_v2 }
 0x599   :  { %2207 = vmatpush3.msra.mxu0 %v2566_v4 }
 0x59a   :  { %2208 = vmatprep.subr.mxu0 %v2493_v2 }
 0x59b   :  { %2209 = vmatpush3.msra.mxu0 %v2579_v7 }
 0x59c   :  { %2210 = vmatprep.subr.mxu0 %v2493_v2 }
 0x59d   :  { %2211 = vmatpush3.msra.mxu0 %v2589_v9 }
 0x59e   :  { %2226 = vmatprep.subr.mxu0 %v2493_v2 }
 0x656   :  { %v461_v8 = vpop.f32.mrf.mxu0 }
 0x657   :  { %v465_v10 = vadd.f32 %v461_v8, %v162_v6 }
 0x658   :  { %v2192_v11 = vpop.f32.mrf.mxu0 }
 0x659   :  { %v1998_v12 = vmul.f32 -1.442695, %v465_v10 }
 0x65b   :  { %2377 = vpow2.f32 %v1998_v12 }
 0x65c   :  { %2379 = vtanh.f32 %v465_v10 }
 0x668   :  { %v2378_v14 = vpop.eup %2377 }
 0x669   :  { %v470_v15 = vadd.f32 1.0, %v2378_v14  ;;  %v2380_v16 = vpop.eup %2379 }
 0x66b   :  { %2381 = vrcp.f32 %v470_v15 }
 0x678   :  { %v2382_v17 = vpop.eup %2381 }
 0x679   :  { %v473_v18 = vsel %vm2625_vm4, %v2380_v16, %v2382_v17 }
 0x67a   :  { %476 = vrot.lane.b32.xlu0 %v473_v18, %s2495_s3  ;;  %v474_v21 = vmul.f32 %v473_v18, %v383_v50 }
 0x6ec   :  { %v477_v19 = vpop.permute.xlu0 %476 }
 0x6ed   :  { %v479_v20 = vmul.f32 %v477_v19, %v473_v18 }
 0x6ef   :  { %481 = vrot.lane.b32.xlu1 %v479_v20, %s2496_s29 }
 0x761   :  { %v482_v22 = vpop.permute.xlu1 %481 }
 0x762   :  { %v484_v24 = vadd.f32 %v482_v22, %v474_v21 }
 0x764   :  { %2383 = vtanh.f32 %v484_v24 }
 0x771   :  { %v2384_v25 = vpop.eup %2383 }
 0x772   :  { %487 = vrot.lane.b32.xlu0 %v2384_v25, %s2495_s3  ;;  %v999_v25 = vld [vmem:[%s3023_s4 + $0x18] sm:$0xff] }
 0x7e4   :  { %v488_v26 = vpop.permute.xlu0 %487 }
 0x7e5   :  { %v490_v27 = vmul.f32 %v488_v26, %v473_v18 }
 0x7e7   :  { %492 = vrot.lane.b32.xlu1 %v490_v27, %s2496_s29 }
 0x859   :  { %v2711_v28 = vpop.permute.xlu1 %492 }
 0x85a   :  { %2202 = vmatmul.mubr.msk.f32.vlgmr.msra.gmra.mxu1 %vm60_vm1, %v2711_v28 }
 0x85b   :  { %2216 = vmatpush3.msra.mxu1 %v2558_v3  ;;  %2223 = vmatprep.mubr.msk.f32.mxu1 %vm2494_vm0, %v2493_v2 }
 0x85c   :  { %2217 = vmatprep.subr.mxu1 %v2493_v2 }
 0x85d   :  { %2218 = vmatpush3.msra.mxu1 %v2566_v4 }
 0x85e   :  { %2219 = vmatprep.subr.mxu1 %v2493_v2 }
 0x85f   :  { %2220 = vmatpush3.msra.mxu1 %v2579_v7 }
 0x860   :  { %2221 = vmatprep.subr.mxu1 %v2493_v2 }
 0x861   :  { %2222 = vmatpush3.msra.mxu1 %v2589_v9 }
 0x862   :  { %2237 = vmatprep.subr.mxu1 %v2493_v2 }
 0x91a   :  { %v562_v30 = vpop.f32.mrf.mxu1 }
 0x91b   :  { %v566_v31 = vadd.f32 %v562_v30, %v167_v29 }
 0x91c   :  { %v2203_v32 = vpop.f32.mrf.mxu1 }
 0x91d   :  { %v2000_v33 = vmul.f32 -1.442695, %v566_v31  ;;  %v997_v32 = vld [vmem:[%s3023_s4 + $0x8] sm:$0xff] }
 0x91f   :  { %2385 = vpow2.f32 %v2000_v33  ;;  %v996_v33 = vld [vmem:[%s3023_s4] sm:$0xff] }
 0x920   :  { %2387 = vtanh.f32 %v566_v31  ;;  %v998_v31 = vld [vmem:[%s3023_s4 + $0x10] sm:$0xff] }
 0x92c   :  { %v2386_v34 = vpop.eup %2385 }
 0x92d   :  { %v571_v36 = vadd.f32 1.0, %v2386_v34  ;;  %v2388_v37 = vpop.eup %2387 }
 0x92f   :  { %2389 = vrcp.f32 %v571_v36 }
 0x93c   :  { %v2390_v38 = vpop.eup %2389 }
 0x93d   :  { %v574_v39 = vsel %vm2625_vm4, %v2388_v37, %v2390_v38 }
 0x93e   :  { %577 = vrot.lane.b32.xlu0 %v574_v39, %s2495_s3  ;;  %v575_v42 = vmul.f32 %v574_v39, %v484_v24 }
 0x9b0   :  { %v578_v40 = vpop.permute.xlu0 %577 }
 0x9b1   :  { %v580_v41 = vmul.f32 %v578_v40, %v574_v39 }
 0x9b3   :  { %582 = vrot.lane.b32.xlu1 %v580_v41, %s2496_s29 }
 0xa25   :  { %v583_v43 = vpop.permute.xlu1 %582 }
 0xa26   :  { %v585_v44 = vadd.f32 %v583_v43, %v575_v42 }
 0xa28   :  { %2391 = vtanh.f32 %v585_v44 }
 0xa35   :  { %v2392_v45 = vpop.eup %2391 }
 0xa36   :  { %588 = vrot.lane.b32.xlu0 %v2392_v45, %s2495_s3 }
 0xaa8   :  { %v589_v46 = vpop.permute.xlu0 %588 }
 0xaa9   :  { %v591_v47 = vmul.f32 %v589_v46, %v574_v39 }
 0xaab   :  { %593 = vrot.lane.b32.xlu1 %v591_v47, %s2496_s29  ;;  %v2809_v47 = vld [vmem:[%s3024_s5 + $0x18] sm:$0xff] }
 0xb1d   :  { %v2732_v48 = vpop.permute.xlu1 %593 }
 0xb1e   :  { %2213 = vmatmul.mubr.msk.f32.vlgmr.msra.gmra.mxu0 %vm60_vm1, %v2732_v48 }
 0xb1f   :  { %2227 = vmatpush3.msra.mxu0 %v2558_v3  ;;  %2234 = vmatprep.mubr.msk.f32.mxu0 %vm2494_vm0, %v2493_v2 }
 0xb20   :  { %2228 = vmatprep.subr.mxu0 %v2493_v2 }
 0xb21   :  { %2229 = vmatpush3.msra.mxu0 %v2566_v4 }
 0xb22   :  { %2230 = vmatprep.subr.mxu0 %v2493_v2 }
 0xb23   :  { %2231 = vmatpush3.msra.mxu0 %v2579_v7 }
 0xb24   :  { %2232 = vmatprep.subr.mxu0 %v2493_v2 }
 0xb25   :  { %2233 = vmatpush3.msra.mxu0 %v2589_v9 }
 0xb26   :  { %2248 = vmatprep.subr.mxu0 %v999_v25 }
 0xbde   :  { %v663_v50 = vpop.f32.mrf.mxu0 }
 0xbdf   :  { %v667_v51 = vadd.f32 %v663_v50, %v172_v49  ;;  %v2822_v49 = vld [vmem:[%s3024_s5 + $0x8] sm:$0xff]  ;;  %v2829_v50 = vld [vmem:[%s3024_s5] sm:$0xff] }
 0xbe0   :  { %v2214_v52 = vpop.f32.mrf.mxu0 }
 0xbe1   :  { %v2002_v53 = vmul.f32 -1.442695, %v667_v51 }
 0xbe3   :  { %2393 = vpow2.f32 %v2002_v53 }
 0xbe4   :  { %2395 = vtanh.f32 %v667_v51 }
 0xbf0   :  { %v2394_v54 = vpop.eup %2393 }
 0xbf1   :  { %v672_v55 = vadd.f32 1.0, %v2394_v54  ;;  %v2396_v56 = vpop.eup %2395  ;;  %v187_v54 = vadd.f32 %v2700_v1, %v2622_v13 }
 0xbf3   :  { %2397 = vrcp.f32 %v672_v55 }
 0xc00   :  { %v2398_v57 = vpop.eup %2397 }
 0xc01   :  { %v675_v58 = vsel %vm2625_vm4, %v2396_v56, %v2398_v57 }
 0xc02   :  { %678 = vrot.lane.b32.xlu0 %v675_v58, %s2495_s3  ;;  %v676_v62 = vmul.f32 %v675_v58, %v585_v44 }
 0xc74   :  { %v679_v59 = vpop.permute.xlu0 %678 }
 0xc75   :  { %v681_v61 = vmul.f32 %v679_v59, %v675_v58 }
 0xc77   :  { %683 = vrot.lane.b32.xlu1 %v681_v61, %s2496_s29  ;;  %v2865_v61 = vld [vmem:[%s3025_s6] ss:$0 sm:$0xff] }
 0xce9   :  { %v684_v0 = vpop.permute.xlu1 %683 }
 0xcea   :  { %v686_v6 = vadd.f32 %v684_v0, %v676_v62 }
 0xcec   :  { %2399 = vtanh.f32 %v686_v6 }
 0xcf9   :  { %v2400_v8 = vpop.eup %2399 }
 0xcfa   :  { %689 = vrot.lane.b32.xlu0 %v2400_v8, %s2495_s3 }
 0xd6c   :  { %v690_v10 = vpop.permute.xlu0 %689 }
 0xd6d   :  { %v692_v11 = vmul.f32 %v690_v10, %v675_v58 }
 0xd6f   :  { %694 = vrot.lane.b32.xlu1 %v692_v11, %s2496_s29 }
 0xde1   :  { %v695_v12 = vpop.permute.xlu1 %694 }
 0xde2   :  { %2224 = vmatmul.mubr.msk.f32.vlgmr.msra.gmra.mxu1 %vm60_vm1, %v695_v12 }
 0xde3   :  { %2238 = vmatpush3.msra.mxu1 %v2558_v3  ;;  %2245 = vmatprep.mubr.msk.f32.mxu1 %vm2494_vm0, %v2493_v2  ;;  %v177_v3 = vadd.f32 %v2696_v63, %v2622_v13 }
 0xde4   :  { %2239 = vmatprep.subr.mxu1 %v2493_v2 }
 0xde5   :  { %2240 = vmatpush3.msra.mxu1 %v2566_v4 }
 0xde6   :  { %2241 = vmatprep.subr.mxu1 %v2493_v2 }
 0xde7   :  { %2242 = vmatpush3.msra.mxu1 %v2579_v7 }
 0xde8   :  { %2243 = vmatprep.subr.mxu1 %v2493_v2 }
 0xde9   :  { %2244 = vmatpush3.msra.mxu1 %v2589_v9 }
 0xdea   :  { %2268 = vmatprep.subr.mxu1 %v2493_v2 }
 0xea2   :  { %v764_v14 = vpop.f32.mrf.mxu1 }
 0xea3   :  { %v768_v15 = vadd.f32 %v764_v14, %v177_v3 }
 0xea4   :  { %v2225_v16 = vpop.f32.mrf.mxu1 }
 0xea5   :  { %v2004_v17 = vmul.f32 -1.442695, %v768_v15 }
 0xea7   :  { %2401 = vpow2.f32 %v2004_v17 }
 0xea8   :  { %2403 = vtanh.f32 %v768_v15 }
 0xeb4   :  { %v2402_v18 = vpop.eup %2401 }
 0xeb5   :  { %v773_v4 = vadd.f32 1.0, %v2402_v18  ;;  %v2404_v19 = vpop.eup %2403 }
 0xeb7   :  { %2405 = vrcp.f32 %v773_v4 }
 0xec4   :  { %v2406_v7 = vpop.eup %2405 }
 0xec5   :  { %v776_v20 = vsel %vm2625_vm4, %v2404_v19, %v2406_v7 }
 0xec6   :  { %779 = vrot.lane.b32.xlu0 %v776_v20, %s2495_s3  ;;  %v777_v63 = vmul.f32 %v776_v20, %v686_v6 }
 0xf38   :  { %v780_v9 = vpop.permute.xlu0 %779 }
 0xf39   :  { %v782_v21 = vmul.f32 %v780_v9, %v776_v20 }
 0xf3b   :  { %784 = vrot.lane.b32.xlu1 %v782_v21, %s2496_s29 }
 0xfad   :  { %v785_v22 = vpop.permute.xlu1 %784 }
 0xfae   :  { %v787_v24 = vadd.f32 %v785_v22, %v777_v63 }
 0xfb0   :  { %2407 = vtanh.f32 %v787_v24 }
 0xfbd   :  { %v2408_v26 = vpop.eup %2407 }
 0xfbe   :  { %790 = vrot.lane.b32.xlu0 %v2408_v26, %s2495_s3 }
0x1030   :  { %v791_v27 = vpop.permute.xlu0 %790 }
0x1031   :  { %v793_v29 = vmul.f32 %v791_v27, %v776_v20 }
0x1033   :  { %795 = vrot.lane.b32.xlu1 %v793_v29, %s2496_s29 }
0x10a5   :  { %v796_v30 = vpop.permute.xlu1 %795 }
0x10a6   :  { %2235 = vmatmul.mubr.msk.f32.vlgmr.msra.gmra.mxu0 %vm60_vm1, %v796_v30 }
0x10a7   :  { %2249 = vmatpush3.msra.mxu0 %v999_v25  ;;  %2256 = vmatprep.mubr.msk.f32.mxu0 %vm60_vm1, %v2635_v35  ;;  %v182_v35 = vadd.f32 %v2622_v13, %v2702_v5 }
0x10a8   :  { %2250 = vmatprep.subr.mxu0 %v998_v31 }
0x10a9   :  { %2251 = vmatpush3.msra.mxu0 %v998_v31 }
0x10aa   :  { %2252 = vmatprep.subr.mxu0 %v997_v32 }
0x10ab   :  { %2253 = vmatpush3.msra.mxu0 %v997_v32 }
0x10ac   :  { %2254 = vmatprep.subr.mxu0 %v996_v33 }
0x10ad   :  { %2255 = vmatpush3.msra.mxu0 %v996_v33 }
0x10ae   :  { %2257 = vmatmul.mubr.msk.f32.vlgmr.msra.gmra.mxu0 %vm60_vm1, %v2682_v60  ;;  %2290 = vmatprep.subr.mxu0 %v2493_v2 }
0x10af   :  { %2259 = vmatprep.mubr.msk.f32.mxu0 %vm60_vm1, %v2711_v28  ;;  %2291 = vmatpush3.msra.mxu0 %v2809_v47 }
0x10b0   :  { %2292 = vmatprep.subr.mxu0 %v2493_v2 }
0x10b2   :  { %2260 = vmatmul.mubr.msk.f32.gmra.mxu0 %vm60_vm1, %v2732_v48  ;;  %v2815_v48 = vld [vmem:[%s3024_s5 + $0x10] sm:$0xff] }
0x10b3   :  { %2262 = vmatprep.mubr.msk.f32.mxu0 %vm60_vm1, %v695_v12  ;;  %2293 = vmatpush3.msra.mxu0 %v2815_v48 }
0x10b4   :  { %2294 = vmatprep.subr.mxu0 %v2493_v2 }
0x10b5   :  { %2295 = vmatpush3.msra.mxu0 %v2822_v49 }
0x10b6   :  { %2263 = vmatmul.mubr.msk.f32.gmra.mxu0 %vm60_vm1, %v796_v30  ;;  %2296 = vmatprep.subr.mxu0 %v2493_v2 }
0x10b7   :  { %2297 = vmatpush3.msra.mxu0 %v2829_v50 }
0x10b8   :  { %2312 = vmatprep.subr.mxu0 %v2493_v2 }
0x1166   :  { %v865_v34 = vpop.f32.mrf.mxu0 }
0x1167   :  { %v869_v36 = vadd.f32 %v865_v34, %v182_v35 }
0x1168   :  { %v2236_v37 = vpop.f32.mrf.mxu0 }
0x1169   :  { %v2006_v38 = vmul.f32 -1.442695, %v869_v36 }
0x116b   :  { %2409 = vpow2.f32 %v2006_v38 }
0x116c   :  { %2411 = vtanh.f32 %v869_v36 }
0x116e   :  { %v2860_v55 = vpop.f32.mrf.mxu0 }
0x116f   :  { %v1088_v34 = vadd.f32 %v2860_v55, %v2865_v61 }
0x1170   :  { %v1082_v59 = vpop.f32.mrf.mxu0 }
0x1171   :  { %v1083_v62 = vadd.f32 %v2865_v61, %v1082_v59 }
0x1178   :  { %v2410_v60 = vpop.eup %2409 }
0x1179   :  { %v874_v39 = vadd.f32 1.0, %v2410_v60  ;;  %v2412_v28 = vpop.eup %2411 }
0x117b   :  { %2413 = vrcp.f32 %v874_v39 }
0x1188   :  { %v2414_v40 = vpop.eup %2413 }
0x1189   :  { %v877_v41 = vsel %vm2625_vm4, %v2412_v28, %v2414_v40 }
0x118a   :  { %880 = vrot.lane.b32.xlu0 %v877_v41, %s2495_s3  ;;  %v878_v5 = vmul.f32 %v877_v41, %v787_v24 }
0x11fc   :  { %v881_v42 = vpop.permute.xlu0 %880 }
0x11fd   :  { %v883_v43 = vmul.f32 %v881_v42, %v877_v41 }
0x11ff   :  { %885 = vrot.lane.b32.xlu1 %v883_v43, %s2496_s29 }
0x1271   :  { %v886_v44 = vpop.permute.xlu1 %885 }
0x1272   :  { %v2802_v45 = vadd.f32 %v886_v44, %v878_v5 }
0x1274   :  { %2415 = vtanh.f32 %v2802_v45 }
0x1281   :  { %v2416_v46 = vpop.eup %2415 }
0x1282   :  { %891 = vrot.lane.b32.xlu0 %v2416_v46, %s2495_s3 }
0x12f4   :  { %v892_v51 = vpop.permute.xlu0 %891 }
0x12f5   :  { %v894_v52 = vmul.f32 %v892_v51, %v877_v41 }
0x12f7   :  { %896 = vrot.lane.b32.xlu1 %v894_v52, %s2496_s29 }
0x1369   :  { %v897_v53 = vpop.permute.xlu1 %896 }
0x136a   :  { %2246 = vmatmul.mubr.msk.f32.vlgmr.msra.gmra.mxu1 %vm60_vm1, %v897_v53  ;;  %2265 = vmatprep.mubr.msk.f32.mxu0 %vm60_vm1, %v897_v53 }
0x136b   :  { %2269 = vmatpush3.msra.mxu1 %v2809_v47  ;;  %2276 = vmatprep.mubr.msk.f32.mxu1 %vm2494_vm0, %v2493_v2 }
0x136c   :  { %2270 = vmatprep.subr.mxu1 %v2493_v2 }
0x136d   :  { %2271 = vmatpush3.msra.mxu1 %v2815_v48 }
0x136e   :  { %2272 = vmatprep.subr.mxu1 %v2493_v2 }
0x136f   :  { %2273 = vmatpush3.msra.mxu1 %v2822_v49 }
0x1370   :  { %2274 = vmatprep.subr.mxu1 %v2493_v2 }
0x1371   :  { %2275 = vmatpush3.msra.mxu1 %v2829_v50 }
0x1372   :  { %2277 = vmatmul.mubr.f32.vlgmr.msra.gmra.mxu1 %v2493_v2  ;;  %2279 = vmatprep.subr.mxu1 %v2493_v2 }
0x1373   :  { %2280 = vmatpush3.msra.mxu1 %v2809_v47  ;;  %2287 = vmatprep.mubr.msk.f32.mxu1 %vm2494_vm0, %v2493_v2 }
0x1374   :  { %2281 = vmatprep.subr.mxu1 %v2493_v2 }
0x1375   :  { %2282 = vmatpush3.msra.mxu1 %v2815_v48 }
0x1376   :  { %2283 = vmatprep.subr.mxu1 %v2493_v2 }
0x1377   :  { %2284 = vmatpush3.msra.mxu1 %v2822_v49 }
0x1378   :  { %2285 = vmatprep.subr.mxu1 %v2493_v2 }
0x1379   :  { %2286 = vmatpush3.msra.mxu1 %v2829_v50 }
0x137a   :  { %2301 = vmatprep.subr.mxu1 %v2493_v2 }
0x142a   :  { %v966_v56 = vpop.f32.mrf.mxu1 }
0x142b   :  { %v970_v57 = vadd.f32 %v966_v56, %v187_v54  ;;  %v2261_v56 = vpop.f32.mrf.mxu0 }
0x142c   :  { %v2247_v58 = vpop.f32.mrf.mxu1 }
0x142d   :  { %v2008_v16 = vmul.f32 -1.442695, %v970_v57 }
0x1432   :  { %v1187_v0 = vpop.f32.mrf.mxu1 }
0x1433   :  { %v1191_v6 = vadd.f32 %v1187_v0, %v1083_v62 }
0x1434   :  { %v2278_v8 = vpop.f32.mrf.mxu1 }
0x1435   :  { %v2018_v10 = vmul.f32 -1.442695, %v1191_v6 }
0x1437   :  { %2417 = vpow2.f32 %v2018_v10 }
0x1438   :  { %2419 = vtanh.f32 %v1191_v6 }
0x1444   :  { %v2418_v11 = vpop.eup %2417 }
0x1445   :  { %v1196_v13 = vadd.f32 1.0, %v2418_v11  ;;  %v2420_v1 = vpop.eup %2419 }
0x1447   :  { %2421 = vrcp.f32 %v1196_v13 }
0x1448   :  { %2423 = vpow2.f32 %v2008_v16 }
0x1454   :  { %v2422_v12 = vpop.eup %2421 }
0x1455   :  { %v1199_v3 = vsel %vm2625_vm4, %v2420_v1, %v2422_v12  ;;  %v2424_v17 = vpop.eup %2423 }
0x1456   :  { %1202 = vrot.lane.b32.xlu0 %v1199_v3, %s2495_s3  ;;  %v1200_v18 = vmul.f32 0.0, %v1199_v3  ;;  %v975_v4 = vadd.f32 1.0, %v2424_v17 }
0x14c8   :  { %v1203_v14 = vpop.permute.xlu0 %1202 }
0x14c9   :  { %v1205_v15 = vmul.f32 %v1203_v14, %v1199_v3 }
0x14cb   :  { %1207 = vrot.lane.b32.xlu1 %v1205_v15, %s2496_s29 }
0x153d   :  { %v1208_v19 = vpop.permute.xlu1 %1207 }
0x153e   :  { %v1210_v7 = vadd.f32 %v1208_v19, %v1200_v18 }
0x1540   :  { %2425 = vtanh.f32 %v1210_v7 }
0x1541   :  { %2427 = vrcp.f32 %v975_v4 }
0x1542   :  { %2429 = vtanh.f32 %v970_v57  ;;  %v1092_v57 = vpop.f32.mrf.mxu0 }
0x1543   :  { %v1093_v6 = vadd.f32 %v2865_v61, %v1092_v57 }
0x1544   :  { %v2914_v58 = vpop.f32.mrf.mxu0 }
0x1546   :  { %v2916_v59 = vpop.f32.mrf.mxu0 }
0x154d   :  { %v2426_v20 = vpop.eup %2425 }
0x154e   :  { %v2428_v9 = vpop.eup %2427  ;;  %1213 = vrot.lane.b32.xlu0 %v2426_v20, %s2495_s3 }
0x154f   :  { %v2430_v21 = vpop.eup %2429 }
0x1550   :  { %v978_v63 = vsel %vm2625_vm4, %v2430_v21, %v2428_v9 }
0x1551   :  { %v979_v29 = vmul.f32 %v978_v63, %v2802_v45 }
0x1552   :  { %981 = vrot.lane.b32.xlu0 %v978_v63, %s2495_s3 }
0x15c0   :  { %v1214_v22 = vpop.permute.xlu0 %1213 }
0x15c1   :  { %v1216_v24 = vmul.f32 %v1214_v22, %v1199_v3 }
0x15c3   :  { %1218 = vrot.lane.b32.xlu1 %v1216_v24, %s2496_s29 }
0x15c4   :  { %v982_v25 = vpop.permute.xlu0 %981 }
0x15c5   :  { %v984_v26 = vmul.f32 %v982_v25, %v978_v63 }
0x15c7   :  { %986 = vrot.lane.b32.xlu0 %v984_v26, %s2496_s29 }
0x1635   :  { %v1219_v27 = vpop.permute.xlu1 %1218 }
0x1636   :  { %2288 = vmatmul.mubr.msk.f32.vlgmr.msra.gmra.mxu1 %vm60_vm1, %v1219_v27 }
0x1637   :  { %2302 = vmatpush3.msra.mxu1 %v2809_v47  ;;  %2309 = vmatprep.mubr.msk.f32.mxu1 %vm2494_vm0, %v2493_v2 }
0x1638   :  { %2303 = vmatprep.subr.mxu1 %v2493_v2 }
0x1639   :  { %v987_v30 = vpop.permute.xlu0 %986  ;;  %2304 = vmatpush3.msra.mxu1 %v2815_v48 }
0x163a   :  { %v989_v31 = vadd.f32 %v987_v30, %v979_v29  ;;  %2305 = vmatprep.subr.mxu1 %v2493_v2 }
0x163b   :  { %2306 = vmatpush3.msra.mxu1 %v2822_v49 }
0x163c   :  { %2431 = vtanh.f32 %v989_v31  ;;  %2307 = vmatprep.subr.mxu1 %v2493_v2 }
0x163d   :  { %2308 = vmatpush3.msra.mxu1 %v2829_v50 }
0x163e   :  { %2323 = vmatprep.subr.mxu1 %v2493_v2 }
0x1649   :  { %v2432_v32 = vpop.eup %2431 }
0x164a   :  { %992 = vrot.lane.b32.xlu0 %v2432_v32, %s2495_s3 }
0x16bc   :  { %v993_v33 = vpop.permute.xlu0 %992 }
0x16bd   :  { %v995_v35 = vmul.f32 %v993_v33, %v978_v63  ;;  %v1098_v63 = vadd.f32 %v2261_v56, %v2865_v61 }
0x16bf   :  { %1012 = vrot.lane.b32.xlu0 %v995_v35, %s2496_s29 }
0x16f6   :  { %v1288_v36 = vpop.f32.mrf.mxu1 }
0x16f7   :  { %v1292_v37 = vadd.f32 %v1288_v36, %v1088_v34 }
0x16f8   :  { %v2289_v38 = vpop.f32.mrf.mxu1 }
0x16f9   :  { %v2020_v60 = vmul.f32 -1.442695, %v1292_v37 }
0x16fb   :  { %2433 = vpow2.f32 %v2020_v60 }
0x16fc   :  { %2435 = vtanh.f32 %v1292_v37 }
0x1708   :  { %v2434_v39 = vpop.eup %2433 }
0x1709   :  { %v1297_v28 = vadd.f32 1.0, %v2434_v39  ;;  %v2436_v40 = vpop.eup %2435 }
0x170b   :  { %2437 = vrcp.f32 %v1297_v28 }
0x1718   :  { %v2438_v41 = vpop.eup %2437 }
0x1719   :  { %v1300_v42 = vsel %vm2625_vm4, %v2436_v40, %v2438_v41  ;;  %v1103_v40 = vadd.f32 %v2865_v61, %v2916_v59 }
0x171a   :  { %1303 = vrot.lane.b32.xlu1 %v1300_v42, %s2495_s3  ;;  %v1301_v45 = vmul.f32 %v1300_v42, %v1210_v7 }
0x1731   :  { %v1013_v43 = vpop.permute.xlu0 %1012 }
0x1732   :  { %2266 = vmatmul.mubr.msk.f32.gmra.mxu0 %vm60_vm1, %v1013_v43 }
0x1733   :  { %2298 = vmatprep.mubr.msk.f32.mxu0 %vm2494_vm0, %v2493_v2 }
0x178c   :  { %v1304_v5 = vpop.permute.xlu1 %1303 }
0x178d   :  { %v1306_v44 = vmul.f32 %v1304_v5, %v1300_v42 }
0x178f   :  { %1308 = vrot.lane.b32.xlu1 %v1306_v44, %s2496_s29 }
0x17f2   :  { %v2918_v62 = vpop.f32.mrf.mxu0 }
0x17f4   :  { %v2920_v0 = vpop.f32.mrf.mxu0 }
0x1801   :  { %v1309_v46 = vpop.permute.xlu1 %1308 }
0x1802   :  { %v1311_v51 = vadd.f32 %v1309_v46, %v1301_v45 }
0x1804   :  { %2439 = vtanh.f32 %v1311_v51 }
0x1811   :  { %v2440_v52 = vpop.eup %2439 }
0x1812   :  { %1314 = vrot.lane.b32.xlu1 %v2440_v52, %s2495_s3 }
0x1884   :  { %v1315_v53 = vpop.permute.xlu1 %1314 }
0x1885   :  { %v1317_v54 = vmul.f32 %v1315_v53, %v1300_v42 }
0x1887   :  { %1319 = vrot.lane.b32.xlu1 %v1317_v54, %s2496_s29 }
0x18f9   :  { %v1320_v55 = vpop.permute.xlu1 %1319 }
0x18fa   :  { %2299 = vmatmul.mubr.msk.f32.vlgmr.msra.gmra.mxu0 %vm60_vm1, %v1320_v55 }
0x18fb   :  { %2313 = vmatpush3.msra.mxu0 %v2809_v47  ;;  %2320 = vmatprep.mubr.msk.f32.mxu0 %vm2494_vm0, %v2493_v2 }
0x18fc   :  { %2314 = vmatprep.subr.mxu0 %v2493_v2 }
0x18fd   :  { %2315 = vmatpush3.msra.mxu0 %v2815_v48 }
0x18fe   :  { %2316 = vmatprep.subr.mxu0 %v2493_v2 }
0x18ff   :  { %2317 = vmatpush3.msra.mxu0 %v2822_v49 }
0x1900   :  { %2318 = vmatprep.subr.mxu0 %v2493_v2 }
0x1901   :  { %2319 = vmatpush3.msra.mxu0 %v2829_v50 }
0x1902   :  { %2334 = vmatprep.subr.mxu0 %v2493_v2 }
0x19ba   :  { %v1389_v8 = vpop.f32.mrf.mxu0 }
0x19bb   :  { %v1393_v10 = vadd.f32 %v1389_v8, %v1093_v6 }
0x19bc   :  { %v2300_v11 = vpop.f32.mrf.mxu0 }
0x19bd   :  { %v2022_v13 = vmul.f32 -1.442695, %v1393_v10  ;;  %v1108_v11 = vadd.f32 %v2914_v58, %v2865_v61 }
0x19bf   :  { %2441 = vpow2.f32 %v2022_v13 }
0x19c0   :  { %2443 = vtanh.f32 %v1393_v10 }
0x19cc   :  { %v2442_v1 = vpop.eup %2441 }
0x19cd   :  { %v1398_v12 = vadd.f32 1.0, %v2442_v1  ;;  %v2444_v3 = vpop.eup %2443 }
0x19cf   :  { %2445 = vrcp.f32 %v1398_v12 }
0x19dc   :  { %v2446_v14 = vpop.eup %2445 }
0x19dd   :  { %v1401_v15 = vsel %vm2625_vm4, %v2444_v3, %v2446_v14 }
0x19de   :  { %1404 = vrot.lane.b32.xlu0 %v1401_v15, %s2495_s3  ;;  %v1402_v18 = vmul.f32 %v1401_v15, %v1311_v51 }
0x1a50   :  { %v1405_v16 = vpop.permute.xlu0 %1404 }
0x1a51   :  { %v1407_v17 = vmul.f32 %v1405_v16, %v1401_v15 }
0x1a53   :  { %1409 = vrot.lane.b32.xlu1 %v1407_v17, %s2496_s29 }
0x1ac5   :  { %v1410_v4 = vpop.permute.xlu1 %1409 }
0x1ac6   :  { %v1412_v19 = vadd.f32 %v1410_v4, %v1402_v18 }
0x1ac8   :  { %2447 = vtanh.f32 %v1412_v19 }
0x1ad5   :  { %v2448_v7 = vpop.eup %2447 }
0x1ad6   :  { %1415 = vrot.lane.b32.xlu0 %v2448_v7, %s2495_s3 }
0x1b48   :  { %v1416_v20 = vpop.permute.xlu0 %1415 }
0x1b49   :  { %v1418_v9 = vmul.f32 %v1416_v20, %v1401_v15  ;;  %v1113_v20 = vadd.f32 %v2865_v61, %v2920_v0 }
0x1b4b   :  { %1420 = vrot.lane.b32.xlu1 %v1418_v9, %s2496_s29 }
0x1bbd   :  { %v1421_v21 = vpop.permute.xlu1 %1420 }
0x1bbe   :  { %2310 = vmatmul.mubr.msk.f32.vlgmr.msra.gmra.mxu1 %vm60_vm1, %v1421_v21 }
0x1bbf   :  { %2324 = vmatpush3.msra.mxu1 %v2809_v47  ;;  %2331 = vmatprep.mubr.msk.f32.mxu1 %vm2494_vm0, %v2493_v2 }
0x1bc0   :  { %2325 = vmatprep.subr.mxu1 %v2493_v2 }
0x1bc1   :  { %2326 = vmatpush3.msra.mxu1 %v2815_v48 }
0x1bc2   :  { %2327 = vmatprep.subr.mxu1 %v2493_v2 }
0x1bc3   :  { %2328 = vmatpush3.msra.mxu1 %v2822_v49 }
0x1bc4   :  { %2329 = vmatprep.subr.mxu1 %v2493_v2 }
0x1bc5   :  { %2330 = vmatpush3.msra.mxu1 %v2829_v50 }
0x1bc6   :  { %2345 = vmatprep.subr.mxu1 %v2493_v2 }
0x1c7e   :  { %v1490_v22 = vpop.f32.mrf.mxu1 }
0x1c7f   :  { %v1494_v24 = vadd.f32 %v1490_v22, %v1098_v63 }
0x1c80   :  { %v2311_v25 = vpop.f32.mrf.mxu1 }
0x1c81   :  { %v2024_v26 = vmul.f32 -1.442695, %v1494_v24 }
0x1c83   :  { %2449 = vpow2.f32 %v2024_v26 }
0x1c84   :  { %2451 = vtanh.f32 %v1494_v24 }
0x1c90   :  { %v2450_v27 = vpop.eup %2449 }
0x1c91   :  { %v1499_v29 = vadd.f32 1.0, %v2450_v27  ;;  %v2452_v30 = vpop.eup %2451 }
0x1c93   :  { %2453 = vrcp.f32 %v1499_v29 }
0x1ca0   :  { %v2454_v31 = vpop.eup %2453 }
0x1ca1   :  { %v1502_v32 = vsel %vm2625_vm4, %v2452_v30, %v2454_v31 }
0x1ca2   :  { %1505 = vrot.lane.b32.xlu0 %v1502_v32, %s2495_s3  ;;  %v1503_v34 = vmul.f32 %v1502_v32, %v1412_v19 }
0x1d14   :  { %v1506_v33 = vpop.permute.xlu0 %1505 }
0x1d15   :  { %v1508_v35 = vmul.f32 %v1506_v33, %v1502_v32 }
0x1d17   :  { %1510 = vrot.lane.b32.xlu1 %v1508_v35, %s2496_s29 }
0x1d89   :  { %v1511_v36 = vpop.permute.xlu1 %1510 }
0x1d8a   :  { %v1513_v37 = vadd.f32 %v1511_v36, %v1503_v34 }
0x1d8c   :  { %2455 = vtanh.f32 %v1513_v37 }
0x1d99   :  { %v2456_v38 = vpop.eup %2455 }
0x1d9a   :  { %1516 = vrot.lane.b32.xlu0 %v2456_v38, %s2495_s3  ;;  %v1118_v38 = vadd.f32 %v2918_v62, %v2865_v61  ;;  %v2033_v61 = vld [vmem:[%s3026_s7] ss:$0 sm:$0xff] }
0x1e0c   :  { %v1517_v60 = vpop.permute.xlu0 %1516 }
0x1e0d   :  { %v1519_v39 = vmul.f32 %v1517_v60, %v1502_v32 }
0x1e0f   :  { %1521 = vrot.lane.b32.xlu1 %v1519_v39, %s2496_s29 }
0x1e81   :  { %v1522_v28 = vpop.permute.xlu1 %1521 }
0x1e82   :  { %2321 = vmatmul.mubr.msk.f32.vlgmr.msra.gmra.mxu0 %vm60_vm1, %v1522_v28 }
0x1e83   :  { %2335 = vmatpush3.msra.mxu0 %v2809_v47  ;;  %2342 = vmatprep.mubr.msk.f32.mxu0 %vm2494_vm0, %v2493_v2 }
0x1e84   :  { %2336 = vmatprep.subr.mxu0 %v2493_v2 }
0x1e85   :  { %2337 = vmatpush3.msra.mxu0 %v2815_v48 }
0x1e86   :  { %2338 = vmatprep.subr.mxu0 %v2493_v2 }
0x1e87   :  { %2339 = vmatpush3.msra.mxu0 %v2822_v49 }
0x1e88   :  { %2340 = vmatprep.subr.mxu0 %v2493_v2 }
0x1e89   :  { %2341 = vmatpush3.msra.mxu0 %v2829_v50 }
0x1f42   :  { %v1591_v41 = vpop.f32.mrf.mxu0 }
0x1f43   :  { %v1595_v42 = vadd.f32 %v1591_v41, %v1103_v40 }
0x1f44   :  { %v2322_v43 = vpop.f32.mrf.mxu0 }
0x1f45   :  { %v2026_v5 = vmul.f32 -1.442695, %v1595_v42 }
0x1f47   :  { %2457 = vpow2.f32 %v2026_v5 }
0x1f48   :  { %2459 = vtanh.f32 %v1595_v42 }
0x1f54   :  { %v2458_v44 = vpop.eup %2457 }
0x1f55   :  { %v1600_v45 = vadd.f32 1.0, %v2458_v44  ;;  %v2460_v46 = vpop.eup %2459 }
0x1f57   :  { %2461 = vrcp.f32 %v1600_v45 }
0x1f64   :  { %v2462_v51 = vpop.eup %2461 }
0x1f65   :  { %v1603_v52 = vsel %vm2625_vm4, %v2460_v46, %v2462_v51 }
0x1f66   :  { %1606 = vrot.lane.b32.xlu0 %v1603_v52, %s2495_s3  ;;  %v1604_v55 = vmul.f32 %v1603_v52, %v1513_v37 }
0x1fd8   :  { %v1607_v53 = vpop.permute.xlu0 %1606 }
0x1fd9   :  { %v1609_v54 = vmul.f32 %v1607_v53, %v1603_v52 }
0x1fdb   :  { %1611 = vrot.lane.b32.xlu1 %v1609_v54, %s2496_s29 }
0x204d   :  { %v1612_v56 = vpop.permute.xlu1 %1611 }
0x204e   :  { %v1614_v57 = vadd.f32 %v1612_v56, %v1604_v55 }
0x2050   :  { %2463 = vtanh.f32 %v1614_v57 }
0x205d   :  { %v2464_v59 = vpop.eup %2463 }
0x205e   :  { %1617 = vrot.lane.b32.xlu0 %v2464_v59, %s2495_s3 }
0x20d0   :  { %v1618_v6 = vpop.permute.xlu0 %1617 }
0x20d1   :  { %v1620_v8 = vmul.f32 %v1618_v6, %v1603_v52 }
0x20d3   :  { %1622 = vrot.lane.b32.xlu1 %v1620_v8, %s2496_s29 }
0x2145   :  { %v1623_v10 = vpop.permute.xlu1 %1622 }
0x2146   :  { %2332 = vmatmul.mubr.msk.f32.vlgmr.msra.gmra.mxu1 %vm60_vm1, %v1623_v10 }
0x2147   :  { %2346 = vmatpush3.msra.mxu1 %v2809_v47  ;;  %2353 = vmatprep.mubr.msk.f32.mxu1 %vm2494_vm0, %v2493_v2 }
0x2148   :  { %2347 = vmatprep.subr.mxu1 %v2493_v2 }
0x2149   :  { %2348 = vmatpush3.msra.mxu1 %v2815_v48 }
0x214a   :  { %2349 = vmatprep.subr.mxu1 %v2493_v2 }
0x214b   :  { %2350 = vmatpush3.msra.mxu1 %v2822_v49 }
0x214c   :  { %2351 = vmatprep.subr.mxu1 %v2493_v2 }
0x214d   :  { %2352 = vmatpush3.msra.mxu1 %v2829_v50 }
0x2206   :  { %v1692_v13 = vpop.f32.mrf.mxu1 }
0x2207   :  { %v1696_v47 = vadd.f32 %v1692_v13, %v1108_v11 }
0x2208   :  { %v2333_v1 = vpop.f32.mrf.mxu1 }
0x2209   :  { %v2028_v12 = vmul.f32 -1.442695, %v1696_v47 }
0x220b   :  { %2465 = vpow2.f32 %v2028_v12 }
0x220c   :  { %2467 = vtanh.f32 %v1696_v47  ;;  %v2035_v47 = vld [vmem:[%s3027_s8] ss:$0 sm:$0xff] }
0x2218   :  { %v2466_v3 = vpop.eup %2465 }
0x2219   :  { %v1701_v14 = vadd.f32 1.0, %v2466_v3  ;;  %v2468_v48 = vpop.eup %2467 }
0x221b   :  { %2469 = vrcp.f32 %v1701_v14 }
0x2228   :  { %v2470_v15 = vpop.eup %2469 }
0x2229   :  { %v1704_v49 = vsel %vm2625_vm4, %v2468_v48, %v2470_v15 }
0x222a   :  { %1707 = vrot.lane.b32.xlu0 %v1704_v49, %s2495_s3  ;;  %v1705_v58 = vmul.f32 %v1704_v49, %v1614_v57 }
0x229c   :  { %v1708_v2 = vpop.permute.xlu0 %1707 }
0x229d   :  { %v1710_v50 = vmul.f32 %v1708_v2, %v1704_v49 }
0x229f   :  { %1712 = vrot.lane.b32.xlu1 %v1710_v50, %s2496_s29 }
0x2311   :  { %v1713_v16 = vpop.permute.xlu1 %1712 }
0x2312   :  { %v1715_v17 = vadd.f32 %v1713_v16, %v1705_v58 }
0x2314   :  { %2471 = vtanh.f32 %v1715_v17 }
0x2321   :  { %v2472_v18 = vpop.eup %2471 }
0x2322   :  { %1718 = vrot.lane.b32.xlu0 %v2472_v18, %s2495_s3 }
0x2394   :  { %v1719_v4 = vpop.permute.xlu0 %1718 }
0x2395   :  { %v1721_v19 = vmul.f32 %v1719_v4, %v1704_v49 }
0x2397   :  { %1723 = vrot.lane.b32.xlu1 %v1721_v19, %s2496_s29 }
0x2409   :  { %v1724_v7 = vpop.permute.xlu1 %1723 }
0x240a   :  { %2343 = vmatmul.mubr.msk.f32.vlgmr.msra.gmra.mxu0 %vm60_vm1, %v1724_v7 }
0x24ca   :  { %v1793_v9 = vpop.f32.mrf.mxu0 }
0x24cb   :  { %v1797_v21 = vadd.f32 %v1793_v9, %v1113_v20 }
0x24cc   :  { %v2344_v63 = vpop.f32.mrf.mxu0 }
0x24cd   :  { %v2030_v22 = vmul.f32 -1.442695, %v1797_v21 }
0x24cf   :  { %2473 = vpow2.f32 %v2030_v22 }
0x24d0   :  { %2475 = vtanh.f32 %v1797_v21 }
0x24dc   :  { %v2474_v24 = vpop.eup %2473 }
0x24dd   :  { %v1802_v25 = vadd.f32 1.0, %v2474_v24  ;;  %v2476_v26 = vpop.eup %2475 }
0x24df   :  { %2477 = vrcp.f32 %v1802_v25 }
0x24ec   :  { %v2478_v27 = vpop.eup %2477 }
0x24ed   :  { %v1805_v29 = vsel %vm2625_vm4, %v2476_v26, %v2478_v27 }
0x24ee   :  { %1808 = vrot.lane.b32.xlu0 %v1805_v29, %s2495_s3  ;;  %v1806_v0 = vmul.f32 %v1805_v29, %v1715_v17 }
0x2560   :  { %v1809_v30 = vpop.permute.xlu0 %1808 }
0x2561   :  { %v1811_v31 = vmul.f32 %v1809_v30, %v1805_v29 }
0x2563   :  { %1813 = vrot.lane.b32.xlu1 %v1811_v31, %s2496_s29 }
0x25d5   :  { %v1814_v32 = vpop.permute.xlu1 %1813 }
0x25d6   :  { %v1816_v33 = vadd.f32 %v1814_v32, %v1806_v0 }
0x25d8   :  { %2479 = vtanh.f32 %v1816_v33 }
0x25e5   :  { %v2480_v35 = vpop.eup %2479 }
0x25e6   :  { %1819 = vrot.lane.b32.xlu0 %v2480_v35, %s2495_s3 }
0x2658   :  { %v1820_v34 = vpop.permute.xlu0 %1819 }
0x2659   :  { %v1822_v36 = vmul.f32 %v1820_v34, %v1805_v29 }
0x265b   :  { %1824 = vrot.lane.b32.xlu1 %v1822_v36, %s2496_s29 }
0x26cd   :  { %v1825_v37 = vpop.permute.xlu1 %1824 }
0x26ce   :  { %2354 = vmatmul.mubr.msk.f32.vlgmr.msra.gmra.mxu1 %vm60_vm1, %v1825_v37 }
0x278e   :  { %v1894_v60 = vpop.f32.mrf.mxu1 }
0x278f   :  { %v1898_v39 = vadd.f32 %v1894_v60, %v1118_v38 }
0x2790   :  { %v2355_v28 = vpop.f32.mrf.mxu1 }
0x2791   :  { %v2032_v40 = vmul.f32 -1.442695, %v1898_v39 }
0x2793   :  { %2481 = vpow2.f32 %v2032_v40 }
0x2794   :  { %2483 = vtanh.f32 %v1898_v39 }
0x27a0   :  { %v2482_v41 = vpop.eup %2481 }
0x27a1   :  { %v1903_v42 = vadd.f32 1.0, %v2482_v41  ;;  %v2484_v43 = vpop.eup %2483 }
0x27a3   :  { %2485 = vrcp.f32 %v1903_v42 }
0x27b0   :  { %v2486_v5 = vpop.eup %2485 }
0x27b1   :  { %v1906_v44 = vsel %vm2625_vm4, %v2484_v43, %v2486_v5 }
0x27b2   :  { %1909 = vrot.lane.b32.xlu0 %v1906_v44, %s2495_s3  ;;  %v1907_v62 = vmul.f32 %v1906_v44, %v1816_v33 }
0x2824   :  { %v1910_v45 = vpop.permute.xlu0 %1909 }
0x2825   :  { %v1912_v46 = vmul.f32 %v1910_v45, %v1906_v44 }
0x2827   :  { %1914 = vrot.lane.b32.xlu1 %v1912_v46, %s2496_s29 }
0x282b   :  { %1931 = vrot.lane.b32.xlu1 %v2033_v61, %s2497_s15 }
0x2899   :  { %v1915_v51 = vpop.permute.xlu1 %1914 }
0x289a   :  { %v1917_v52 = vadd.f32 %v1915_v51, %v1907_v62 }
0x289c   :  { %2487 = vtanh.f32 %v1917_v52 }
0x289d   :  { %v1932_v55 = vpop.permute.xlu1 %1931 }
0x28a9   :  { %v2488_v53 = vpop.eup %2487 }
0x28aa   :  { %1920 = vrot.lane.b32.xlu0 %v2488_v53, %s2495_s3 }
0x28ae   :  { %1947 = vrot.lane.b32.xlu0 %v2034_v23, %s2497_s15 }
0x291c   :  { %v1921_v54 = vpop.permute.xlu0 %1920 }
0x291d   :  { %v1923_v56 = vmul.f32 %v1921_v54, %v1906_v44 }
0x291f   :  { %v1934_v57 = vmul.f32 %v1932_v55, %v1923_v56 }
0x2920   :  { %v1948_v59 = vpop.permute.xlu0 %1947 }
0x2921   :  { %v1950_v6 = vmul.f32 %v1948_v59, %v1923_v56  ;;  %1936 = vrot.lane.b32.xlu1 %v1934_v57, %s2496_s29 }
0x2923   :  { %1952 = vrot.lane.b32.xlu0 %v1950_v6, %s2496_s29 }
0x2993   :  { %v1937_v8 = vpop.permute.xlu1 %1936 }
0x2994   :  { %v1939_v10 = vsel %vm60_vm1, %v1937_v8, 0.0 }
0x2995   :  { %1940 = vadd.xlane.f32.xlu1 %v1939_v10  ;;  %v1953_v11 = vpop.permute.xlu0 %1952 }
0x2996   :  { %v1955_v13 = vsel %vm60_vm1, %v1953_v11, 0.0 }
0x2997   :  { %1956 = vadd.xlane.f32.xlu0 %v1955_v13 }
0x2a1e   :  { %v1941_v1 = vpop.xlane.xlu1 %1940 }
0x2a20   :  { %v1957_v12 = vpop.xlane.xlu0 %1956 }
0x2a21   :  { %v1959_v3 = vsel %vm1958_vm5, %v1941_v1, %v1957_v12 }
0x2a22   :  { %v1967_v14 = vadd.f32 %v2035_v47, %v1959_v3 }
0x2a24   :  { %v1969_v48 = vsel %vm1968_vm6, %v1967_v14, -inf }
0x2a25   :  { %1970 = vmax.xlane.f32.xlu0 %v1969_v48 }
0x2aae   :  { %v1971_v15 = vpop.xlane.xlu0 %1970 }
0x2aaf   :  { %v1972_v49 = vsub.f32 %v1967_v14, %v1971_v15 }
0x2ab1   :  { %v1973_v2 = vmul.f32 1.442695, %v1972_v49 }
0x2ab3   :  { %2489 = vpow2.f32 %v1973_v2 }
0x2ac0   :  { %v2490_v50 = vpop.eup %2489 }
0x2ac1   :  { %v1975_v58 = vsel %vm1968_vm6, %v2490_v50, 0.0 }
0x2ac2   :  { %1976 = vadd.xlane.f32.xlu1 %v1975_v58 }
0x2b4b   :  { %v1977_v16 = vpop.xlane.xlu1 %1976 }
0x2b4c   :  { %2491 = vrcp.f32 %v1977_v16 }
0x2b59   :  { %v2492_v17 = vpop.eup %2491 }
0x2b5a   :  { %v1979_v18 = vmul.f32 %v2492_v17, %v2490_v50 }
0x2b5c   :  { %1980 = vst.msk [vmem:[%s3028_s9] sm:$0xff] %vm1968_vm6, %v1979_v18 }

</bundles_post_ra>
